<compile_context>
chip_gen: v7x
topology: tpu7x:2x2x1
jax: 0.10.0
libtpu: 0.0.40
codegen_flags: <defaults>
</compile_context>

<pallas_src>
import functools

import jax
import jax.numpy as jnp
from jax import lax
from jax.experimental import pallas as pl
from jax.experimental.pallas import tpu as pltpu

DILATIONS = (1, 6, 18)
KSIZE = 3


def _aspp_kernel(taps_ref, w_ref, b_ref, wf_ref, bf_ref, out_ref, *, n_branches):
    # taps_ref: (n_branches, TILE_M, 9*Cin)  bf16  shifted input rows, taps folded into K
    # w_ref:    (n_branches, 9*Cin, Cout)    bf16  3x3 conv weights, taps folded into K
    # b_ref:    (n_branches, Cout)           f32   3x3 conv biases
    # wf_ref:   (n_branches*Cout, Cout)      bf16  1x1 final conv weight
    # bf_ref:   (1, Cout)                    f32   1x1 final conv bias
    # out_ref:  (TILE_M, Cout)               f32
    acts = []
    for r in range(n_branches):
        # Dilated 3x3 conv for branch r as ONE matmul with K = 9*Cin (MXU-internal acc).
        acc = jnp.dot(taps_ref[r], w_ref[r], preferred_element_type=jnp.float32)
        # Bias + ReLU epilogue in f32.
        acts.append(jnp.maximum(acc + b_ref[pl.ds(r, 1), :], 0.0))
    # concat(channels) + 1x1 conv == one matmul with K = n_branches*Cout.
    cat = jnp.concatenate(acts, axis=-1).astype(jnp.bfloat16)
    final = jnp.dot(cat, wf_ref[...], preferred_element_type=jnp.float32) + bf_ref[...]
    out_ref[...] = final.astype(out_ref.dtype)


def _default_tile_m():
    """Pick a row-tile size; bigger where VMEM allows, v7x-safe otherwise."""
    try:
        vmem = getattr(pltpu.get_tpu_info(), "vmem_capacity_bytes",
                       64 * 1024 * 1024)
    except Exception:
        vmem = 64 * 1024 * 1024
    return 512 if vmem >= 128 * 1024 * 1024 else 256


def _build_taps(x_nhwc, dilations, pad):
    """Glue: per-branch im2col rows, taps folded into channels.

    Returns (n_branches, N*H*W, 9*Cin) with tap order (ky, kx, cin) matching a
    reshape of HWIO weights to (9*Cin, Cout).
    """
    N, H, W, C = x_nhwc.shape
    xp = jnp.pad(x_nhwc, ((0, 0), (pad, pad), (pad, pad), (0, 0)))
    branches = []
    for d in dilations:
        cols = []
        for ky in range(KSIZE):
            for kx in range(KSIZE):
                ys = pad + (ky - 1) * d
                xs = pad + (kx - 1) * d
                cols.append(xp[:, ys:ys + H, xs:xs + W, :])
        branches.append(jnp.concatenate(cols, axis=-1).reshape(N * H * W, KSIZE * KSIZE * C))
    return jnp.stack(branches, axis=0)


def aspp_pallas(x_nchw, ws, bs, wf, bf):
    """ws: list of (3,3,Cin,Cout) HWIO weights; bs: list of (Cout,);
       wf: (3*Cout, Cout); bf: (Cout,). Returns NCHW output (f32)."""
    N, Cin, H, W = x_nchw.shape
    Cout = wf.shape[1]
    nb = len(DILATIONS)
    K9 = KSIZE * KSIZE * Cin
    pad = max(DILATIONS)

    x_nhwc = jnp.transpose(x_nchw, (0, 2, 3, 1)).astype(jnp.float32)
    taps = _build_taps(x_nhwc, DILATIONS, pad).astype(jnp.bfloat16)   # (nb, M, 9*Cin)

    M = N * H * W
    tile_m = _default_tile_m()
    n_tiles = pl.cdiv(M, tile_m)
    m_pad = n_tiles * tile_m
    if m_pad != M:
        taps = jnp.pad(taps, ((0, 0), (0, m_pad - M), (0, 0)))

    # Weights: taps folded into K, MXU inputs in bf16; biases stay f32.
    w_all = jnp.stack([w.reshape(K9, Cout) for w in ws], axis=0).astype(jnp.bfloat16)
    b_all = jnp.stack(bs, axis=0).astype(jnp.float32)                 # (nb, Cout)
    wf_b = wf.astype(jnp.bfloat16)                                    # (nb*Cout, Cout)
    bf2 = bf.reshape(1, Cout).astype(jnp.float32)

    kernel = functools.partial(_aspp_kernel, n_branches=nb)
    out = pl.pallas_call(
        kernel,
        out_shape=jax.ShapeDtypeStruct((m_pad, Cout), jnp.float32),
        grid_spec=pltpu.PrefetchScalarGridSpec(
            num_scalar_prefetch=0,
            grid=(n_tiles,),
            in_specs=[
                pl.BlockSpec((nb, tile_m, K9), lambda i: (0, i, 0)),   # tap rows, tiled on M
                pl.BlockSpec(w_all.shape, lambda i: (0, 0, 0)),        # resident weights
                pl.BlockSpec(b_all.shape, lambda i: (0, 0)),
                pl.BlockSpec(wf_b.shape, lambda i: (0, 0)),
                pl.BlockSpec(bf2.shape, lambda i: (0, 0)),
            ],
            out_specs=pl.BlockSpec((tile_m, Cout), lambda i: (i, 0)),
        ),
        compiler_params=pltpu.CompilerParams(
            dimension_semantics=("parallel",),          # M tiles independent -> megacore on v7x
            vmem_limit_bytes=32 * 1024 * 1024),
    )(taps, w_all, b_all, wf_b, bf2)

    out_nhwc = out[:M].reshape(N, H, W, Cout)
    return jnp.transpose(out_nhwc, (0, 3, 1, 2))  # back to NCHW like PyTorch


def aspp_reference(x_nchw, ws, bs, wf, bf):
    """Pure-JAX reference matching PyTorch semantics (for verification)."""
    x = jnp.transpose(x_nchw, (0, 2, 3, 1)).astype(jnp.float32)
    outs = []
    for r, d in enumerate(DILATIONS):
        y = lax.conv_general_dilated(
            x, ws[r], window_strides=(1, 1),
            padding=[(d, d), (d, d)], rhs_dilation=(d, d),
            dimension_numbers=('NHWC', 'HWIO', 'NHWC'))
        outs.append(jax.nn.relu(y + bs[r]))
    cat = jnp.concatenate(outs, axis=-1)
    out = jnp.einsum('nhwc,cd->nhwd', cat, wf) + bf
    return jnp.transpose(out, (0, 3, 1, 2))


if __name__ == "__main__":
    key = jax.random.PRNGKey(0)
    N, Cin, H, W = 2, 4, 16, 16
    Cout = 8

    keys = jax.random.split(key, 1 + 2 * len(DILATIONS) + 2)
    x = jax.random.normal(keys[0], (N, Cin, H, W), jnp.float32)

    ws, bs = [], []
    for r in range(len(DILATIONS)):
        ws.append(0.1 * jax.random.normal(keys[1 + 2 * r], (KSIZE, KSIZE, Cin, Cout),
                                          jnp.float32))
        bs.append(0.05 * jax.random.normal(keys[2 + 2 * r], (Cout,), jnp.float32))
    wf = 0.1 * jax.random.normal(keys[-2], (len(DILATIONS) * Cout, Cout), jnp.float32)
    bf = 0.05 * jax.random.normal(keys[-1], (Cout,), jnp.float32)

    out = aspp_pallas(x, ws, bs, wf, bf)
    jax.block_until_ready(out)

    ref = aspp_reference(x, ws, bs, wf, bf)
    assert out.shape == (N, Cout, H, W)
    # bf16 MXU inputs with f32 accumulation -> tolerance loosened accordingly.
    max_err = float(jnp.max(jnp.abs(out - ref)))
    assert max_err < 3e-2, f"mismatch vs reference, max abs err = {max_err}"

    print("KERNEL_OK")
</pallas_src>

<mosaic_0001>
module attributes {stable_mosaic.version = 11 : i64} {
  func.func @_aspp_kernel(%arg0: i32, %arg1: memref<3x256x36xbf16, #tpu.memory_space<vmem>>, %arg2: memref<3x36x8xbf16, #tpu.memory_space<vmem>>, %arg3: memref<3x8xf32, #tpu.memory_space<vmem>>, %arg4: memref<24x8xbf16, #tpu.memory_space<vmem>>, %arg5: memref<1x8xf32, #tpu.memory_space<vmem>>, %arg6: memref<256x8xf32, #tpu.memory_space<vmem>>) attributes {dimension_semantics = [#tpu.dimension_semantics<parallel>], iteration_bounds = array<i64: 2>, scalar_prefetch = 0 : i64, scratch_operands = 0 : i64, tpu.core_type = #tpu.core_type<tc>, window_params = [{transform_indices = @transform_0, window_bounds = array<i64: 3, 256, 36>}, {pipeline_mode = #tpu.pipeline_mode<synchronous>, transform_indices = @transform_1, window_bounds = array<i64: 3, 36, 8>}, {pipeline_mode = #tpu.pipeline_mode<synchronous>, transform_indices = @transform_2, window_bounds = array<i64: 3, 8>}, {pipeline_mode = #tpu.pipeline_mode<synchronous>, transform_indices = @transform_3, window_bounds = array<i64: 24, 8>}, {pipeline_mode = #tpu.pipeline_mode<synchronous>, transform_indices = @transform_4, window_bounds = array<i64: 1, 8>}, {transform_indices = @transform_5, window_bounds = array<i64: 256, 8>}]} {
    %c0 = arith.constant 0 : index
    %c0_0 = arith.constant 0 : index
    %c0_1 = arith.constant 0 : index
    %0 = vector.load %arg1[%c0, %c0_0, %c0_1] : memref<3x256x36xbf16, #tpu.memory_space<vmem>>, vector<1x256x36xbf16>
    %1 = vector.shape_cast %0 : vector<1x256x36xbf16> to vector<256x36xbf16>
    %c0_2 = arith.constant 0 : index
    %c0_3 = arith.constant 0 : index
    %c0_4 = arith.constant 0 : index
    %2 = vector.load %arg2[%c0_2, %c0_3, %c0_4] : memref<3x36x8xbf16, #tpu.memory_space<vmem>>, vector<1x36x8xbf16>
    %3 = vector.shape_cast %2 : vector<1x36x8xbf16> to vector<36x8xbf16>
    %cst = arith.constant dense<0.000000e+00> : vector<256x8xf32>
    %4 = tpu.matmul %1, %3, %cst {dimension_numbers = #tpu.dot_dimension_numbers<[1], [0], [0], [1], [0, 0, 1, 1], [], []>} : vector<256x36xbf16>, vector<36x8xbf16>, vector<256x8xf32> -> vector<256x8xf32>
    %c0_5 = arith.constant 0 : index
    %c0_6 = arith.constant 0 : index
    %5 = vector.load %arg3[%c0_5, %c0_6] : memref<3x8xf32, #tpu.memory_space<vmem>>, vector<1x8xf32>
    %6 = vector.broadcast %5 : vector<1x8xf32> to vector<256x8xf32>
    %7 = arith.addf %4, %6 : vector<256x8xf32>
    %cst_7 = arith.constant 0.000000e+00 : f32
    %8 = vector.broadcast %cst_7 : f32 to vector<256x8xf32>
    %9 = arith.maximumf %7, %8 : vector<256x8xf32>
    %c1 = arith.constant 1 : index
    %c0_8 = arith.constant 0 : index
    %c0_9 = arith.constant 0 : index
    %10 = vector.load %arg1[%c1, %c0_8, %c0_9] : memref<3x256x36xbf16, #tpu.memory_space<vmem>>, vector<1x256x36xbf16>
    %11 = vector.shape_cast %10 : vector<1x256x36xbf16> to vector<256x36xbf16>
    %c1_10 = arith.constant 1 : index
    %c0_11 = arith.constant 0 : index
    %c0_12 = arith.constant 0 : index
    %12 = vector.load %arg2[%c1_10, %c0_11, %c0_12] : memref<3x36x8xbf16, #tpu.memory_space<vmem>>, vector<1x36x8xbf16>
    %13 = vector.shape_cast %12 : vector<1x36x8xbf16> to vector<36x8xbf16>
    %cst_13 = arith.constant dense<0.000000e+00> : vector<256x8xf32>
    %14 = tpu.matmul %11, %13, %cst_13 {dimension_numbers = #tpu.dot_dimension_numbers<[1], [0], [0], [1], [0, 0, 1, 1], [], []>} : vector<256x36xbf16>, vector<36x8xbf16>, vector<256x8xf32> -> vector<256x8xf32>
    %c1_14 = arith.constant 1 : index
    %c0_15 = arith.constant 0 : index
    %15 = vector.load %arg3[%c1_14, %c0_15] : memref<3x8xf32, #tpu.memory_space<vmem>>, vector<1x8xf32>
    %16 = vector.broadcast %15 : vector<1x8xf32> to vector<256x8xf32>
    %17 = arith.addf %14, %16 : vector<256x8xf32>
    %cst_16 = arith.constant 0.000000e+00 : f32
    %18 = vector.broadcast %cst_16 : f32 to vector<256x8xf32>
    %19 = arith.maximumf %17, %18 : vector<256x8xf32>
    %c2 = arith.constant 2 : index
    %c0_17 = arith.constant 0 : index
    %c0_18 = arith.constant 0 : index
    %20 = vector.load %arg1[%c2, %c0_17, %c0_18] : memref<3x256x36xbf16, #tpu.memory_space<vmem>>, vector<1x256x36xbf16>
    %21 = vector.shape_cast %20 : vector<1x256x36xbf16> to vector<256x36xbf16>
    %c2_19 = arith.constant 2 : index
    %c0_20 = arith.constant 0 : index
    %c0_21 = arith.constant 0 : index
    %22 = vector.load %arg2[%c2_19, %c0_20, %c0_21] : memref<3x36x8xbf16, #tpu.memory_space<vmem>>, vector<1x36x8xbf16>
    %23 = vector.shape_cast %22 : vector<1x36x8xbf16> to vector<36x8xbf16>
    %cst_22 = arith.constant dense<0.000000e+00> : vector<256x8xf32>
    %24 = tpu.matmul %21, %23, %cst_22 {dimension_numbers = #tpu.dot_dimension_numbers<[1], [0], [0], [1], [0, 0, 1, 1], [], []>} : vector<256x36xbf16>, vector<36x8xbf16>, vector<256x8xf32> -> vector<256x8xf32>
    %c2_23 = arith.constant 2 : index
    %c0_24 = arith.constant 0 : index
    %25 = vector.load %arg3[%c2_23, %c0_24] : memref<3x8xf32, #tpu.memory_space<vmem>>, vector<1x8xf32>
    %26 = vector.broadcast %25 : vector<1x8xf32> to vector<256x8xf32>
    %27 = arith.addf %24, %26 : vector<256x8xf32>
    %cst_25 = arith.constant 0.000000e+00 : f32
    %28 = vector.broadcast %cst_25 : f32 to vector<256x8xf32>
    %29 = arith.maximumf %27, %28 : vector<256x8xf32>
    %30 = tpu.concatenate %9, %19, %29 in 1 : vector<256x8xf32>, vector<256x8xf32>, vector<256x8xf32> -> vector<256x24xf32>
    %31 = arith.truncf %30 : vector<256x24xf32> to vector<256x24xbf16>
    %c0_26 = arith.constant 0 : index
    %c0_27 = arith.constant 0 : index
    %32 = vector.load %arg4[%c0_26, %c0_27] : memref<24x8xbf16, #tpu.memory_space<vmem>>, vector<24x8xbf16>
    %cst_28 = arith.constant dense<0.000000e+00> : vector<256x8xf32>
    %33 = tpu.matmul %31, %32, %cst_28 {dimension_numbers = #tpu.dot_dimension_numbers<[1], [0], [0], [1], [0, 0, 1, 1], [], []>} : vector<256x24xbf16>, vector<24x8xbf16>, vector<256x8xf32> -> vector<256x8xf32>
    %c0_29 = arith.constant 0 : index
    %c0_30 = arith.constant 0 : index
    %34 = vector.load %arg5[%c0_29, %c0_30] : memref<1x8xf32, #tpu.memory_space<vmem>>, vector<1x8xf32>
    %35 = vector.broadcast %34 : vector<1x8xf32> to vector<256x8xf32>
    %36 = arith.addf %33, %35 : vector<256x8xf32>
    %c0_31 = arith.constant 0 : index
    %c0_32 = arith.constant 0 : index
    %37 = vector.load %arg6[%c0_31, %c0_32] : memref<256x8xf32, #tpu.memory_space<vmem>>, vector<256x8xf32>
    tpu.vector_store %arg6[%c0_31, %c0_32], %36 {strides = array<i32>} : memref<256x8xf32, #tpu.memory_space<vmem>>, vector<256x8xf32>,
    return
  }
  func.func @transform_0(%arg0: i32) -> (i32, i32, i32) {
    %c0_i32 = arith.constant 0 : i32
    %c0_i32_0 = arith.constant 0 : i32
    %c0_i32_1 = arith.constant 0 : i32
    return %c0_i32, %arg0, %c0_i32_0 : i32, i32, i32
  }
  func.func @transform_1(%arg0: i32) -> (i32, i32, i32) {
    %c0_i32 = arith.constant 0 : i32
    %c0_i32_0 = arith.constant 0 : i32
    %c0_i32_1 = arith.constant 0 : i32
    %c0_i32_2 = arith.constant 0 : i32
    return %c0_i32, %c0_i32_0, %c0_i32_1 : i32, i32, i32
  }
  func.func @transform_2(%arg0: i32) -> (i32, i32) {
    %c0_i32 = arith.constant 0 : i32
    %c0_i32_0 = arith.constant 0 : i32
    %c0_i32_1 = arith.constant 0 : i32
    return %c0_i32, %c0_i32_0 : i32, i32
  }
  func.func @transform_3(%arg0: i32) -> (i32, i32) {
    %c0_i32 = arith.constant 0 : i32
    %c0_i32_0 = arith.constant 0 : i32
    %c0_i32_1 = arith.constant 0 : i32
    return %c0_i32, %c0_i32_0 : i32, i32
  }
  func.func @transform_4(%arg0: i32) -> (i32, i32) {
    %c0_i32 = arith.constant 0 : i32
    %c0_i32_0 = arith.constant 0 : i32
    %c0_i32_1 = arith.constant 0 : i32
    return %c0_i32, %c0_i32_0 : i32, i32
  }
  func.func @transform_5(%arg0: i32) -> (i32, i32) {
    %c0_i32 = arith.constant 0 : i32
    %c0_i32_0 = arith.constant 0 : i32
    return %arg0, %c0_i32 : i32, i32
  }
}

</mosaic_0001>

<bundles_post_ra>
// kernel: tpu_custom_call.1
= control target key start
LH: loop header
LB: loop body
LE: loop exit
PB: predicated region body
PF: predicated region fallthrough
CT: control target
= control target key end

     0   :  { %s3209_s18 = smov 0   ;;  %s3211_s19 = smov 0   ;;  %s3959_s0 = inlined_call_operand.vmem [shape: bf16[3,512,36], index: 0, kind: input, shape index: {}]   ;;  %s3960_s1 = inlined_call_operand.vmem [shape: bf16[3,36,8], index: 1, kind: input, shape index: {}]   ;;  %s3961_s2 = inlined_call_operand.vmem [shape: f32[3,8], index: 2, kind: input, shape index: {}]   ;;  %s3962_s3 = inlined_call_operand.vmem [shape: bf16[24,8], index: 3, kind: input, shape index: {}]   ;;  %s3963_s4 = inlined_call_operand.vmem [shape: f32[1,8], index: 4, kind: input, shape index: {}]   ;;  %s3964_s5 = inlined_call_operand.vmem [shape: f32[512,8], index: 5, kind: output, shape index: {}]  }
   0x1   :  { %s3213_s20 = smov 0  }
   0x2 LB: > { %s2464_s21 = sadd.s32 4294967295, %s3175_s20   ;;  %s3226_s22 = sadd.s32 1, %s3175_s20   ;;  %s3175_s20 = sphi %s3213_s20, %s3973_s20   ;;  %s3171_s19 = sphi %s3211_s19, %s3972_s19   ;;  %s3167_s18 = sphi %s3209_s18, %s3971_s18  }
   0x3   : > { %s19_s23 = ssub.s32 %s3175_s20, %s3226_s22  ;;  %s22_s24 = sadd.s32 1, %s3171_s19 }
   0x4   : > { %p20_p0 = scmp.eq.s32.totalorder %s19_s23, 0  ;;  %p29_p1 = scmp.ne.s32.totalorder %s3171_s19, %s3167_s18 }
   0x5   : > { %p30_p2 = scmp.eq.s32.totalorder %s3175_s20, 0  ;;  %p2467_p4 = scmp.ge.s32.totalorder %s3175_s20, 2 }
   0x6   : > { %s3235_s25 = scalar_select %p20_p0, %s3171_s19, %s22_s24  }
   0x7   : > { %p31_p3 = por %p30_p2, %p29_p1  ;;  %177 = sbr.rel (%p2467_p4) target bundleno = 43 (0x2b), region = 32 }
   0xe   : > { %180 = sbr.rel (!%p31_p3) target bundleno = 43 (0x2b), region = 36  ;;  %s182_s26 = sand.u32 (%p31_p3), 1, %s3171_s19  }
   0xf   : > { %s2676_s27 = sshll.u32 (%p31_p3), %s3175_s20, 7  ;;  %s2906_s28 = smul.u32 (%p31_p3), 384, %s182_s26 }
  0x10   : > { %s3243_s6 = scalar_lea.vmem (%p31_p3), %s3959_s0, %s2676_s27 }
  0x11   : > { %v203_v0 = vld [vmem:[%s3243_s6] sm:$0xff] (%p31_p3)   ;;  %v207_v1 = vld [vmem:[%s3243_s6 + $0x8] sm:$0xff] (%p31_p3)   ;;  %v211_v2 = vld [vmem:[%s3243_s6 + $0x10] sm:$0xff] (%p31_p3)   ;;  %s3251_s7 = scalar_lea.vmem (%p31_p3), [#allocation2], %s2906_s28 }
  0x12   : > { %v215_v3 = vld [vmem:[%s3243_s6 + $0x18] sm:$0xff] (%p31_p3)   ;;  %v219_v4 = vld [vmem:[%s3243_s6 + $0x20] sm:$0xff] (%p31_p3)   ;;  %v223_v5 = vld [vmem:[%s3243_s6 + $0x28] sm:$0xff] (%p31_p3)   ;;  %204 = vst [vmem:[%s3251_s7] sm:$0xff] (%p31_p3), %v203_v0  }
  0x13   : > { %208 = vst [vmem:[%s3251_s7 + $0x8] sm:$0xff] (%p31_p3), %v207_v1   ;;  %212 = vst [vmem:[%s3251_s7 + $0x10] sm:$0xff] (%p31_p3), %v211_v2   ;;  %v227_v6 = vld [vmem:[%s3243_s6 + $0x30] sm:$0xff] (%p31_p3)   ;;  %v231_v7 = vld [vmem:[%s3243_s6 + $0x38] sm:$0xff] (%p31_p3)  }
  0x14   : > { %216 = vst [vmem:[%s3251_s7 + $0x18] sm:$0xff] (%p31_p3), %v215_v3   ;;  %220 = vst [vmem:[%s3251_s7 + $0x20] sm:$0xff] (%p31_p3), %v219_v4   ;;  %v235_v8 = vld [vmem:[%s3243_s6 + $0x40] sm:$0xff] (%p31_p3)   ;;  %v239_v9 = vld [vmem:[%s3243_s6 + $0x48] sm:$0xff] (%p31_p3)  }
  0x15   : > { %224 = vst [vmem:[%s3251_s7 + $0x28] sm:$0xff] %v223_v5   ;;  %228 = vst [vmem:[%s3251_s7 + $0x30] sm:$0xff] %v227_v6   ;;  %v243_v10 = vld [vmem:[%s3243_s6 + $0x50] sm:$0xff]   ;;  %v247_v11 = vld [vmem:[%s3243_s6 + $0x58] sm:$0xff]  }
  0x16   : > { %232 = vst [vmem:[%s3251_s7 + $0x38] sm:$0xff] %v231_v7   ;;  %236 = vst [vmem:[%s3251_s7 + $0x40] sm:$0xff] %v235_v8   ;;  %v251_v12 = vld [vmem:[%s3243_s6 + $0x60] sm:$0xff]   ;;  %v255_v13 = vld [vmem:[%s3243_s6 + $0x68] sm:$0xff]  }
  0x17   : > { %240 = vst [vmem:[%s3251_s7 + $0x48] sm:$0xff] %v239_v9   ;;  %244 = vst [vmem:[%s3251_s7 + $0x50] sm:$0xff] %v243_v10   ;;  %v259_v14 = vld [vmem:[%s3243_s6 + $0x70] sm:$0xff]   ;;  %v263_v15 = vld [vmem:[%s3243_s6 + $0x78] sm:$0xff]  }
  0x18   : > { %248 = vst [vmem:[%s3251_s7 + $0x58] sm:$0xff] %v247_v11   ;;  %252 = vst [vmem:[%s3251_s7 + $0x60] sm:$0xff] %v251_v12   ;;  %v267_v16 = vld [vmem:[%s3243_s6 + $0x100] sm:$0xff]   ;;  %v271_v17 = vld [vmem:[%s3243_s6 + $0x108] sm:$0xff]  }
  0x19   : > { %256 = vst [vmem:[%s3251_s7 + $0x68] sm:$0xff] %v255_v13   ;;  %260 = vst [vmem:[%s3251_s7 + $0x70] sm:$0xff] %v259_v14   ;;  %v275_v18 = vld [vmem:[%s3243_s6 + $0x110] sm:$0xff]   ;;  %v279_v19 = vld [vmem:[%s3243_s6 + $0x118] sm:$0xff]  }
  0x1a   : > { %264 = vst [vmem:[%s3251_s7 + $0x78] sm:$0xff] %v263_v15   ;;  %268 = vst [vmem:[%s3251_s7 + $0x80] sm:$0xff] %v267_v16   ;;  %v283_v20 = vld [vmem:[%s3243_s6 + $0x120] sm:$0xff]   ;;  %v287_v21 = vld [vmem:[%s3243_s6 + $0x128] sm:$0xff]  }
  0x1b   : > { %272 = vst [vmem:[%s3251_s7 + $0x88] sm:$0xff] %v271_v17   ;;  %276 = vst [vmem:[%s3251_s7 + $0x90] sm:$0xff] %v275_v18   ;;  %v291_v22 = vld [vmem:[%s3243_s6 + $0x130] sm:$0xff]   ;;  %v295_v23 = vld [vmem:[%s3243_s6 + $0x138] sm:$0xff]  }
  0x1c   : > { %280 = vst [vmem:[%s3251_s7 + $0x98] sm:$0xff] %v279_v19   ;;  %284 = vst [vmem:[%s3251_s7 + $0xa0] sm:$0xff] %v283_v20   ;;  %v299_v24 = vld [vmem:[%s3243_s6 + $0x140] sm:$0xff]   ;;  %v303_v25 = vld [vmem:[%s3243_s6 + $0x148] sm:$0xff]  }
  0x1d   : > { %288 = vst [vmem:[%s3251_s7 + $0xa8] sm:$0xff] %v287_v21   ;;  %292 = vst [vmem:[%s3251_s7 + $0xb0] sm:$0xff] %v291_v22   ;;  %v307_v26 = vld [vmem:[%s3243_s6 + $0x150] sm:$0xff]   ;;  %v311_v27 = vld [vmem:[%s3243_s6 + $0x158] sm:$0xff]  }
  0x1e   : > { %296 = vst [vmem:[%s3251_s7 + $0xb8] sm:$0xff] %v295_v23   ;;  %300 = vst [vmem:[%s3251_s7 + $0xc0] sm:$0xff] %v299_v24   ;;  %v315_v28 = vld [vmem:[%s3243_s6 + $0x160] sm:$0xff]   ;;  %v319_v29 = vld [vmem:[%s3243_s6 + $0x168] sm:$0xff]  }
  0x1f   : > { %304 = vst [vmem:[%s3251_s7 + $0xc8] sm:$0xff] %v303_v25   ;;  %308 = vst [vmem:[%s3251_s7 + $0xd0] sm:$0xff] %v307_v26   ;;  %v323_v30 = vld [vmem:[%s3243_s6 + $0x170] sm:$0xff]   ;;  %v327_v31 = vld [vmem:[%s3243_s6 + $0x178] sm:$0xff]  }
  0x20   : > { %312 = vst [vmem:[%s3251_s7 + $0xd8] sm:$0xff] %v311_v27   ;;  %316 = vst [vmem:[%s3251_s7 + $0xe0] sm:$0xff] %v315_v28   ;;  %v331_v32 = vld [vmem:[%s3243_s6 + $0x200] sm:$0xff]   ;;  %v335_v33 = vld [vmem:[%s3243_s6 + $0x208] sm:$0xff]  }
  0x21   : > { %320 = vst [vmem:[%s3251_s7 + $0xe8] sm:$0xff] %v319_v29   ;;  %324 = vst [vmem:[%s3251_s7 + $0xf0] sm:$0xff] %v323_v30   ;;  %v339_v34 = vld [vmem:[%s3243_s6 + $0x210] sm:$0xff]   ;;  %v343_v35 = vld [vmem:[%s3243_s6 + $0x218] sm:$0xff]  }
  0x22   : > { %328 = vst [vmem:[%s3251_s7 + $0xf8] sm:$0xff] %v327_v31   ;;  %332 = vst [vmem:[%s3251_s7 + $0x100] sm:$0xff] %v331_v32   ;;  %v347_v36 = vld [vmem:[%s3243_s6 + $0x220] sm:$0xff]   ;;  %v351_v37 = vld [vmem:[%s3243_s6 + $0x228] sm:$0xff]  }
  0x23   : > { %336 = vst [vmem:[%s3251_s7 + $0x108] sm:$0xff] %v335_v33   ;;  %340 = vst [vmem:[%s3251_s7 + $0x110] sm:$0xff] %v339_v34   ;;  %v355_v38 = vld [vmem:[%s3243_s6 + $0x230] sm:$0xff]   ;;  %v359_v39 = vld [vmem:[%s3243_s6 + $0x238] sm:$0xff]  }
  0x24   : > { %344 = vst [vmem:[%s3251_s7 + $0x118] sm:$0xff] %v343_v35   ;;  %348 = vst [vmem:[%s3251_s7 + $0x120] sm:$0xff] %v347_v36   ;;  %v363_v40 = vld [vmem:[%s3243_s6 + $0x240] sm:$0xff]   ;;  %v367_v41 = vld [vmem:[%s3243_s6 + $0x248] sm:$0xff]  }
  0x25   : > { %352 = vst [vmem:[%s3251_s7 + $0x128] sm:$0xff] %v351_v37   ;;  %356 = vst [vmem:[%s3251_s7 + $0x130] sm:$0xff] %v355_v38   ;;  %v371_v42 = vld [vmem:[%s3243_s6 + $0x250] sm:$0xff]   ;;  %v375_v43 = vld [vmem:[%s3243_s6 + $0x258] sm:$0xff]  }
  0x26   : > { %360 = vst [vmem:[%s3251_s7 + $0x138] sm:$0xff] %v359_v39   ;;  %364 = vst [vmem:[%s3251_s7 + $0x140] sm:$0xff] %v363_v40   ;;  %v379_v44 = vld [vmem:[%s3243_s6 + $0x260] sm:$0xff]   ;;  %v383_v45 = vld [vmem:[%s3243_s6 + $0x268] sm:$0xff]  }
  0x27   : > { %368 = vst [vmem:[%s3251_s7 + $0x148] sm:$0xff] %v367_v41   ;;  %372 = vst [vmem:[%s3251_s7 + $0x150] sm:$0xff] %v371_v42   ;;  %v387_v46 = vld [vmem:[%s3243_s6 + $0x270] sm:$0xff]   ;;  %v391_v47 = vld [vmem:[%s3243_s6 + $0x278] sm:$0xff]  }
  0x28   : > { %376 = vst [vmem:[%s3251_s7 + $0x158] sm:$0xff] %v375_v43   ;;  %380 = vst [vmem:[%s3251_s7 + $0x160] sm:$0xff] %v379_v44  }
  0x29   : > { %384 = vst [vmem:[%s3251_s7 + $0x168] sm:$0xff] %v383_v45   ;;  %388 = vst [vmem:[%s3251_s7 + $0x170] sm:$0xff] %v387_v46  }
  0x2a   : > { %392 = vst [vmem:[%s3251_s7 + $0x178] sm:$0xff] %v391_v47  }
  0x2b PF: > { %p2470_p5 = scmp.ge.s32.totalorder %s3175_s20, 1  ;;  %p608_p6 = scmp.lt.s32.totalorder %s3175_s20, 3 }
  0x2d   : > { %p609_p7 = pnand %p2470_p5, %p608_p6 }
  0x2f   : > { %612 = sbr.rel (%p609_p7) target bundleno = 750 (0x2ee), region = 77 }
  0x36   : > { %v3094_v48 = vld [vmem:[%s3960_s1] sm:$0xff]   ;;  %vm836_vm0 = vcmask 1041408   ;;  %v3095_v49 = vld [vmem:[%s3960_s1 + $0x14] sm:$0xff]   ;;  %s615_s12 = sand.u32 1, %s3167_s18   ;;  %v3096_v50 = vld [vmem:[%s3960_s1 + $0x8] sm:$0xff]   ;;  %vm787_vm1 = vcmask 293888  }
  0x37   : > { %2752 = vmatprep.subr.bf16.mxu0 %v3094_v48  ;;  %s2907_s15 = smul.u32 384, %s615_s12  ;;  %2790 = vmatprep.subr.bf16.mxu1 %v3095_v49  ;;  %v3097_v51 = vld [vmem:[%s3960_s1 + $0x1c] sm:$0xff]   ;;  %v3098_v52 = vld [vmem:[%s3960_s1 + $0x10] ss:$0 sps:$4 sm:$0x33]   ;;  %v3104_v60 = vld [vmem:[%s3960_s1 + $0x28] sm:$0xff]  }
  0x38   : > { %2753 = vmatpush3.bf16.msra.mxu0 %v3094_v48  ;;  %2791 = vmatpush3.bf16.msra.mxu1 %v3095_v49  ;;  %v3099_v53 = vld [vmem:[%s3960_s1 + $0x24] ss:$0 sps:$4 sm:$0x33]   ;;  %v838_v56 = vsel %vm836_vm0, %v3098_v52, 0  ;;  %v3111_v0 = vld [vmem:[%s3960_s1 + $0x30] sm:$0xff]   ;;  %vm2205_vm2 = vcmask 1043456  }
  0x39   : > { %2754 = vmatprep.subr.bf16.mxu0 %v3096_v50  ;;  %2792 = vmatprep.subr.bf16.mxu1 %v3097_v51  ;;  %s3364_s27 = scalar_lea.vmem [#allocation2], %s2907_s15  ;;  %v1221_v58 = vsel %vm836_vm0, %v3099_v53, 0  ;;  %v3118_v3 = vld [vmem:[%s3960_s1 + $0x38] ss:$0 sps:$4 sm:$0x33]   ;;  %s3177_s15 = smov 8  }
  0x3a   : > { %v3100_v54 = vld [vmem:[%s3364_s27] sm:$0xff]   ;;  %v3102_v57 = vld [vmem:[%s3364_s27 + $0x8] sm:$0xff]   ;;  %v3105_v61 = vld [vmem:[%s3364_s27 + $0x10] sm:$0xff]   ;;  %v1604_v5 = vsel %vm836_vm0, %v3118_v3, 0  ;;  %s3178_s23 = smov 16   ;;  %vm2055_vm3 = vcmask 64512  }
  0x3b   : > { %v3101_v55 = vld [vmem:[%s3364_s27 + $0x80] sm:$0xff]   ;;  %2758 = vmatprep.mubr.msk.bf16.mxu0 %vm787_vm1, %v3100_v54  ;;  %v3103_v59 = vld [vmem:[%s3364_s27 + $0x88] sm:$0xff]   ;;  %v3106_v62 = vld [vmem:[%s3364_s27 + $0x90] sm:$0xff]   ;;  %vm2088_vm4 = vcmask 130048   ;;  %vm2156_vm5 = vcmask 195584   ;;  %s2471_s26 = sshll.u32 %s2464_s21, 5 }
  0x3c   : > { %2755 = vmatpush3.bf16.msra.mxu0 %v3096_v50  ;;  %2793 = vmatpush3.bf16.msra.mxu1 %v3097_v51  ;;  %v3107_v63 = vld [vmem:[%s3364_s27 + $0x18] sm:$0xff]   ;;  %v3109_v2 = vld [vmem:[%s3364_s27 + $0x20] sm:$0xff]   ;;  %v3110_v4 = vld [vmem:[%s3364_s27 + $0x28] sm:$0xff]   ;;  %p644_p8 = scmp.lt.s32.totalorder %s2471_s26, 63 }
  0x3d   : > { %2902 = vmatprep.subr.msk.bf16.mxu0 %vm836_vm0, %v3098_v52  ;;  %2903 = vmatprep.subr.msk.bf16.mxu1 %vm836_vm0, %v3099_v53  ;;  %v3108_v1 = vld [vmem:[%s3364_s27 + $0x98] sm:$0xff]   ;;  %v3112_v6 = vld [vmem:[%s3364_s27 + $0x30] sm:$0xff]   ;;  %v3127_v8 = vld [vmem:[%s3364_s27 + $0xa0] sm:$0xff]  }
  0x3e   : > { %2796 = vmatprep.mubr.msk.bf16.mxu1 %vm787_vm1, %v3101_v55  ;;  %v3113_v7 = vld [vmem:[%s3364_s27 + $0x38] sm:$0xff]   ;;  %v3128_v9 = vld [vmem:[%s3364_s27 + $0xa8] sm:$0xff]   ;;  %v3114_v10 = vld [vmem:[%s3364_s27 + $0x40] sm:$0xff]   ;;  %s3975_s26 = smov (!%p644_p8, %s2471_s26), 63 }
  0x3f   : > { %v3131_v11 = vld [vmem:[%s3364_s27 + $0xb0] sm:$0xff]   ;;  %v3132_v12 = vld [vmem:[%s3364_s27 + $0xb8] sm:$0xff]   ;;  %v3135_v13 = vld [vmem:[%s3364_s27 + $0xc0] sm:$0xff]  }
  0x40   : > { %2757 = vmatpush3.bf16.msra.mxu0 %v838_v56  ;;  %2795 = vmatpush3.bf16.msra.mxu1 %v1221_v58  ;;  %v3115_v14 = vld [vmem:[%s3364_s27 + $0x48] sm:$0xff]   ;;  %v3116_v15 = vld [vmem:[%s3364_s27 + $0x50] sm:$0xff]   ;;  %v3117_v18 = vld [vmem:[%s3364_s27 + $0x58] sm:$0xff]  }
  0x41   : > { %2828 = vmatprep.subr.bf16.mxu0 %v3104_v60  ;;  %v3136_v16 = vld [vmem:[%s3364_s27 + $0xc8] sm:$0xff]   ;;  %v3139_v17 = vld [vmem:[%s3364_s27 + $0xd0] sm:$0xff]   ;;  %v3119_v19 = vld [vmem:[%s3364_s27 + $0x60] sm:$0xff]  }
  0x42   : > { %v3140_v20 = vld [vmem:[%s3364_s27 + $0xd8] sm:$0xff]   ;;  %v3143_v21 = vld [vmem:[%s3364_s27 + $0xe0] sm:$0xff]   ;;  %v3120_v22 = vld [vmem:[%s3364_s27 + $0x68] sm:$0xff]  }
  0x43   : > { %2759 = vmatmul.mubr.msk.bf16.vlgmr.msra.gmra.mrb[0].mxu0 %vm787_vm1, %v3102_v57  ;;  %2797 = vmatmul.mubr.msk.bf16.vlgmr.msra.gmra.mrb[0].mxu1 %vm787_vm1, %v3103_v59  ;;  %v3121_v23 = vld [vmem:[%s3364_s27 + $0x70] sm:$0xff]   ;;  %v3144_v24 = vld [vmem:[%s3364_s27 + $0xe8] sm:$0xff]   ;;  %v3122_v26 = vld [vmem:[%s3364_s27 + $0x78] sm:$0xff]  }
  0x44   : > { %2829 = vmatpush3.bf16.msra.mxu0 %v3104_v60  ;;  %2762 = vmatprep.mubr.msk.bf16.mxu0 %vm787_vm1, %v3105_v61  ;;  %v3147_v25 = vld [vmem:[%s3364_s27 + $0xf0] sm:$0xff]   ;;  %v3123_v27 = vld [vmem:[%s3364_s27 + $0x100] sm:$0xff]   ;;  %v3148_v28 = vld [vmem:[%s3364_s27 + $0xf8] sm:$0xff]  }
  0x45   : > { %2800 = vmatprep.mubr.msk.bf16.mxu1 %vm787_vm1, %v3106_v62  ;;  %2830 = vmatprep.subr.bf16.mxu0 %v3111_v0  ;;  %v3124_v29 = vld [vmem:[%s3364_s27 + $0x108] sm:$0xff]   ;;  %v3125_v30 = vld [vmem:[%s3364_s27 + $0x110] sm:$0xff]   ;;  %v3126_v31 = vld [vmem:[%s3364_s27 + $0x118] sm:$0xff]  }
  0x46   : > { %v3129_v32 = vld [vmem:[%s3364_s27 + $0x120] sm:$0xff]   ;;  %v3130_v33 = vld [vmem:[%s3364_s27 + $0x128] sm:$0xff]   ;;  %v3133_v34 = vld [vmem:[%s3364_s27 + $0x130] sm:$0xff]  }
  0x47   : > { %v3134_v35 = vld [vmem:[%s3364_s27 + $0x138] sm:$0xff]   ;;  %v3137_v36 = vld [vmem:[%s3364_s27 + $0x140] sm:$0xff]   ;;  %v3138_v37 = vld [vmem:[%s3364_s27 + $0x148] sm:$0xff]  }
  0x48   : > { %2831 = vmatpush3.bf16.msra.mxu0 %v3111_v0  ;;  %v3141_v38 = vld [vmem:[%s3364_s27 + $0x150] sm:$0xff]   ;;  %v3142_v39 = vld [vmem:[%s3364_s27 + $0x158] sm:$0xff]   ;;  %v3145_v40 = vld [vmem:[%s3364_s27 + $0x160] sm:$0xff]  }
  0x49   : > { %2904 = vmatprep.subr.msk.bf16.mxu0 %vm836_vm0, %v3118_v3  ;;  %v3146_v41 = vld [vmem:[%s3364_s27 + $0x168] sm:$0xff]   ;;  %v3149_v42 = vld [vmem:[%s3364_s27 + $0x170] sm:$0xff]   ;;  %v3150_v43 = vld [vmem:[%s3364_s27 + $0x178] sm:$0xff]   ;;  %s2472_s27 = sshll.u32 %s3975_s26, 3 }
  0x4a   : > { %v3482_v45 = vld [vmem:[%s3961_s2 + $0x1] ss:$0 sm:$0xff]  ;;  %v3152_v0 = vld [vmem:[%s3962_s3 + $0x8] ss:$0 sps:$4 sm:$0xff]   ;;  %s3851_s7 = scalar_lea.vmem %s3964_s5, %s2472_s27 }
  0x4b   : > { %2763 = vmatmul.mubr.msk.bf16.gmra.mrb[4].mxu0 %vm787_vm1, %v3107_v63  ;;  %2801 = vmatmul.mubr.msk.bf16.gmra.mrb[4].mxu1 %vm787_vm1, %v3108_v1  ;;  %v3151_v63 = vld [vmem:[%s3962_s3] sm:$0xff]  }
  0x4c   : > { %2766 = vmatprep.mubr.msk.bf16.mxu0 %vm787_vm1, %v3109_v2  ;;  %2833 = vmatpush3.bf16.msra.mxu0 %v1604_v5 }
  0x4d   : > { %2804 = vmatprep.mubr.msk.bf16.mxu1 %vm787_vm1, %v3127_v8  ;;  %2866 = vmatprep.subr.bf16.mxu1 %v3151_v63 }
  0x4e   : > { %2867 = vmatpush3.bf16.msra.mxu1 %v3151_v63 }
  0x4f   : > { %2905 = vmatprep.subr.msk.bf16.mxu1 %vm2205_vm2, %v3152_v0 }
  0x53   : > { %2767 = vmatmul.mubr.msk.bf16.gmra.mrb[8].mxu0 %vm787_vm1, %v3110_v4  ;;  %2805 = vmatmul.mubr.msk.bf16.gmra.mrb[8].mxu1 %vm787_vm1, %v3128_v9 }
  0x54   : > { %2770 = vmatprep.mubr.msk.bf16.mxu0 %vm787_vm1, %v3112_v6  ;;  %2808 = vmatprep.mubr.msk.bf16.mxu1 %vm787_vm1, %v3131_v11 }
  0x5b   : > { %2771 = vmatmul.mubr.msk.bf16.gmra.mrb[12].mxu0 %vm787_vm1, %v3113_v7  ;;  %2809 = vmatmul.mubr.msk.bf16.gmra.mrb[12].mxu1 %vm787_vm1, %v3132_v12 }
  0x5c   : > { %2774 = vmatprep.mubr.msk.bf16.mxu0 %vm787_vm1, %v3114_v10  ;;  %2812 = vmatprep.mubr.msk.bf16.mxu1 %vm787_vm1, %v3135_v13  ;;  %v2207_v13 = vsel %vm2205_vm2, %v3152_v0, 0 }
  0x5d   : > { %2869 = vmatpush3.bf16.msra.mxu1 %v2207_v13 }
  0x63   : > { %2775 = vmatmul.mubr.msk.bf16.gmra.mrb[16].mxu0 %vm787_vm1, %v3115_v14  ;;  %2813 = vmatmul.mubr.msk.bf16.gmra.mrb[16].mxu1 %vm787_vm1, %v3136_v16 }
  0x64   : > { %2778 = vmatprep.mubr.msk.bf16.mxu0 %vm787_vm1, %v3116_v15  ;;  %2816 = vmatprep.mubr.msk.bf16.mxu1 %vm787_vm1, %v3139_v17 }
  0x6b   : > { %2779 = vmatmul.mubr.msk.bf16.gmra.mrb[20].mxu0 %vm787_vm1, %v3117_v18  ;;  %2817 = vmatmul.mubr.msk.bf16.gmra.mrb[20].mxu1 %vm787_vm1, %v3140_v20 }
  0x6c   : > { %2782 = vmatprep.mubr.msk.bf16.mxu0 %vm787_vm1, %v3119_v19  ;;  %2820 = vmatprep.mubr.msk.bf16.mxu1 %vm787_vm1, %v3143_v21 }
  0x73   : > { %2783 = vmatmul.mubr.msk.bf16.gmra.mrb[24].mxu0 %vm787_vm1, %v3120_v22  ;;  %2821 = vmatmul.mubr.msk.bf16.gmra.mrb[24].mxu1 %vm787_vm1, %v3144_v24 }
  0x74   : > { %2786 = vmatprep.mubr.msk.bf16.mxu0 %vm787_vm1, %v3121_v23  ;;  %2824 = vmatprep.mubr.msk.bf16.mxu1 %vm787_vm1, %v3147_v25 }
  0x7b   : > { %2787 = vmatmul.mubr.msk.bf16.gmra.mrb[28].mxu0 %vm787_vm1, %v3122_v26  ;;  %2825 = vmatmul.mubr.msk.bf16.gmra.mrb[28].mxu1 %vm787_vm1, %v3148_v28 }
  0x7c   : > { %2834 = vmatprep.mubr.msk.bf16.mxu0 %vm787_vm1, %v3123_v27 }
  0x83   : > { %2835 = vmatmul.mubr.msk.bf16.vlgmr.msra.gmra.mrb[32].mxu0 %vm787_vm1, %v3124_v29 }
  0x84   : > { %2838 = vmatprep.mubr.msk.bf16.mxu0 %vm787_vm1, %v3125_v30 }
  0x8b   : > { %2839 = vmatmul.mubr.msk.bf16.gmra.mrb[36].mxu0 %vm787_vm1, %v3126_v31 }
  0x8c   : > { %2842 = vmatprep.mubr.msk.bf16.mxu0 %vm787_vm1, %v3129_v32 }
  0x93   : > { %2843 = vmatmul.mubr.msk.bf16.gmra.mrb[40].mxu0 %vm787_vm1, %v3130_v33 }
  0x94   : > { %2846 = vmatprep.mubr.msk.bf16.mxu0 %vm787_vm1, %v3133_v34 }
  0x9b   : > { %2847 = vmatmul.mubr.msk.bf16.gmra.mrb[44].mxu0 %vm787_vm1, %v3134_v35 }
  0x9c   : > { %2850 = vmatprep.mubr.msk.bf16.mxu0 %vm787_vm1, %v3137_v36 }
  0xa3   : > { %2851 = vmatmul.mubr.msk.bf16.gmra.mrb[48].mxu0 %vm787_vm1, %v3138_v37 }
  0xa4   : > { %2854 = vmatprep.mubr.msk.bf16.mxu0 %vm787_vm1, %v3141_v38 }
  0xab   : > { %2855 = vmatmul.mubr.msk.bf16.gmra.mrb[52].mxu0 %vm787_vm1, %v3142_v39 }
  0xac   : > { %2858 = vmatprep.mubr.msk.bf16.mxu0 %vm787_vm1, %v3145_v40 }
  0xb3   : > { %2859 = vmatmul.mubr.msk.bf16.gmra.mrb[56].mxu0 %vm787_vm1, %v3146_v41 }
  0xb4   : > { %2862 = vmatprep.mubr.msk.bf16.mxu0 %vm787_vm1, %v3149_v42 }
  0xbb   : > { %2863 = vmatmul.mubr.msk.bf16.gmra.mrb[60].mxu0 %vm787_vm1, %v3150_v43 }
 0x116   : > { %v3477_v44 = vpop.f32.mrb[0].mxu0  ;;  %v2798_v46 = vpop.f32.mrb[0].mxu1 }
 0x117   : > { %v3484_v47 = vpop.f32.mrb[1].mxu0  ;;  %v1266_v48 = vadd.f32 %v2798_v46, %v3482_v45  ;;  %v1257_v49 = vpop.f32.mrb[1].mxu1 }
 0x118   : > { %v3487_v50 = vpop.f32.mrb[2].mxu0  ;;  %v1258_v51 = vadd.f32 %v3482_v45, %v1257_v49  ;;  %v2799_v52 = vpop.f32.mrb[2].mxu1 }
 0x119   : > { %v3490_v53 = vpop.f32.mrb[3].mxu0  ;;  %v1386_v54 = vmax.f32 %v1266_v48, 0.0  ;;  %v1269_v55 = vadd.f32 %v2799_v52, %v3482_v45  ;;  %v1260_v56 = vpop.f32.mrb[3].mxu1 }
 0x11a   : > { %v1384_v57 = vmax.f32 %v1258_v51, 0.0  ;;  %v1261_v58 = vadd.f32 %v3482_v45, %v1260_v56 }
 0x11b   : > { %v1387_v59 = vmax.f32 %v1269_v55, 0.0 }
 0x11c   : > { %v1385_v60 = vmax.f32 %v1261_v58, 0.0 }
 0x11d   : > { %v2939_v61 = vpack.i.bf16 %v1387_v59, %v1386_v54 }
 0x11e   : > { %v3494_v62 = vpop.f32.mrb[4].mxu0  ;;  %v2802_v1 = vpop.f32.mrb[4].mxu1  ;;  %v2934_v3 = vpack.i.bf16 %v1385_v60, %v1384_v57 }
 0x11f   : > { %v3502_v2 = vpop.f32.mrb[5].mxu0  ;;  %v1282_v4 = vadd.f32 %v2802_v1, %v3482_v45  ;;  %v1273_v5 = vpop.f32.mrb[5].mxu1 }
 0x120   : > { %v3505_v6 = vpop.f32.mrb[6].mxu0  ;;  %v1274_v7 = vadd.f32 %v3482_v45, %v1273_v5  ;;  %v2803_v8 = vpop.f32.mrb[6].mxu1  ;;  %2935 = vrot.lane.b32.xlu0 %v2934_v3, %s3177_s15 }
 0x121   : > { %v3509_v9 = vpop.f32.mrb[7].mxu0  ;;  %v1390_v10 = vmax.f32 %v1282_v4, 0.0  ;;  %v1285_v11 = vadd.f32 %v2803_v8, %v3482_v45  ;;  %v1276_v12 = vpop.f32.mrb[7].mxu1 }
 0x122   : > { %v1388_v14 = vmax.f32 %v1274_v7, 0.0  ;;  %v1277_v15 = vadd.f32 %v3482_v45, %v1276_v12 }
 0x123   : > { %v1391_v16 = vmax.f32 %v1285_v11, 0.0 }
 0x124   : > { %v1389_v17 = vmax.f32 %v1277_v15, 0.0  ;;  %2940 = vrot.lane.b32.xlu0 %v2939_v61, %s3177_s15 }
 0x125   : > { %v3514_v18 = vpack.i.bf16 %v1391_v16, %v1390_v10 }
 0x126   : > { %v3516_v19 = vpop.f32.mrb[8].mxu0  ;;  %v2954_v20 = vpack.i.bf16 %v1389_v17, %v1388_v14  ;;  %v2806_v24 = vpop.f32.mrb[8].mxu1 }
 0x127   : > { %v3518_v21 = vpop.f32.mrb[9].mxu0  ;;  %v1298_v25 = vadd.f32 %v2806_v24, %v3482_v45  ;;  %v1289_v26 = vpop.f32.mrb[9].mxu1 }
 0x128   : > { %v3520_v22 = vpop.f32.mrb[10].mxu0  ;;  %2955 = vrot.lane.b32.xlu0 %v2954_v20, %s3177_s15  ;;  %v1290_v28 = vadd.f32 %v3482_v45, %v1289_v26  ;;  %v2807_v29 = vpop.f32.mrb[10].mxu1 }
 0x129   : > { %v3523_v23 = vpop.f32.mrb[11].mxu0  ;;  %v1394_v31 = vmax.f32 %v1298_v25, 0.0  ;;  %v1301_v32 = vadd.f32 %v2807_v29, %v3482_v45  ;;  %v1292_v33 = vpop.f32.mrb[11].mxu1 }
 0x12a   : > { %v1392_v35 = vmax.f32 %v1290_v28, 0.0  ;;  %v1293_v36 = vadd.f32 %v3482_v45, %v1292_v33 }
 0x12b   : > { %v1395_v38 = vmax.f32 %v1301_v32, 0.0 }
 0x12c   : > { %v1393_v39 = vmax.f32 %v1293_v36, 0.0 }
 0x12d   : > { %v3537_v40 = vpack.i.bf16 %v1395_v38, %v1394_v31 }
 0x12e   : > { %v3526_v27 = vpop.f32.mrb[12].mxu0  ;;  %v3539_v41 = vpack.i.bf16 %v1393_v39, %v1392_v35  ;;  %v2810_v42 = vpop.f32.mrb[12].mxu1 }
 0x12f   : > { %v3529_v30 = vpop.f32.mrb[13].mxu0  ;;  %v1314_v43 = vadd.f32 %v2810_v42, %v3482_v45  ;;  %v1305_v46 = vpop.f32.mrb[13].mxu1 }
 0x130   : > { %v3532_v34 = vpop.f32.mrb[14].mxu0  ;;  %v1306_v49 = vadd.f32 %v3482_v45, %v1305_v46  ;;  %v2811_v51 = vpop.f32.mrb[14].mxu1 }
 0x131   : > { %v3535_v37 = vpop.f32.mrb[15].mxu0  ;;  %v1398_v54 = vmax.f32 %v1314_v43, 0.0  ;;  %v1317_v55 = vadd.f32 %v2811_v51, %v3482_v45  ;;  %v1308_v56 = vpop.f32.mrb[15].mxu1 }
 0x132   : > { %v1396_v58 = vmax.f32 %v1306_v49, 0.0  ;;  %v1309_v59 = vadd.f32 %v3482_v45, %v1308_v56 }
 0x133   : > { %v1399_v61 = vmax.f32 %v1317_v55, 0.0 }
 0x134   : > { %v1397_v63 = vmax.f32 %v1309_v59, 0.0 }
 0x135   : > { %v3553_v0 = vpack.i.bf16 %v1399_v61, %v1398_v54 }
 0x136   : > { %v3542_v48 = vpop.f32.mrb[16].mxu0  ;;  %v3555_v1 = vpack.i.bf16 %v1397_v63, %v1396_v58  ;;  %v2814_v3 = vpop.f32.mrb[16].mxu1 }
 0x137   : > { %v3545_v52 = vpop.f32.mrb[17].mxu0  ;;  %v1330_v4 = vadd.f32 %v2814_v3, %v3482_v45  ;;  %v1321_v5 = vpop.f32.mrb[17].mxu1 }
 0x138   : > { %v3548_v57 = vpop.f32.mrb[18].mxu0  ;;  %v1322_v8 = vadd.f32 %v3482_v45, %v1321_v5  ;;  %v2815_v10 = vpop.f32.mrb[18].mxu1 }
 0x139   : > { %v3551_v60 = vpop.f32.mrb[19].mxu0  ;;  %v1402_v12 = vmax.f32 %v1330_v4, 0.0  ;;  %v1333_v13 = vadd.f32 %v2815_v10, %v3482_v45  ;;  %v1324_v14 = vpop.f32.mrb[19].mxu1 }
 0x13a   : > { %v1400_v16 = vmax.f32 %v1322_v8, 0.0  ;;  %v1325_v17 = vadd.f32 %v3482_v45, %v1324_v14 }
 0x13b   : > { %v1403_v24 = vmax.f32 %v1333_v13, 0.0 }
 0x13c   : > { %v1401_v25 = vmax.f32 %v1325_v17, 0.0 }
 0x13d   : > { %v3569_v26 = vpack.i.bf16 %v1403_v24, %v1402_v12 }
 0x13e   : > { %v3558_v7 = vpop.f32.mrb[20].mxu0  ;;  %v3571_v28 = vpack.i.bf16 %v1401_v25, %v1400_v16  ;;  %v2818_v29 = vpop.f32.mrb[20].mxu1 }
 0x13f   : > { %v3561_v11 = vpop.f32.mrb[21].mxu0  ;;  %v1346_v31 = vadd.f32 %v2818_v29, %v3482_v45  ;;  %v1337_v32 = vpop.f32.mrb[21].mxu1 }
 0x140   : > { %v3564_v15 = vpop.f32.mrb[22].mxu0  ;;  %v1338_v35 = vadd.f32 %v3482_v45, %v1337_v32  ;;  %v2819_v36 = vpop.f32.mrb[22].mxu1 }
 0x141   : > { %v3567_v20 = vpop.f32.mrb[23].mxu0  ;;  %v1406_v39 = vmax.f32 %v1346_v31, 0.0  ;;  %v1349_v42 = vadd.f32 %v2819_v36, %v3482_v45  ;;  %v1340_v43 = vpop.f32.mrb[23].mxu1 }
 0x142   : > { %v1404_v49 = vmax.f32 %v1338_v35, 0.0  ;;  %v1341_v51 = vadd.f32 %v3482_v45, %v1340_v43  ;;  %v3606_v35 = vld [vmem:[%s3961_s2 + $0x2] ss:$0 sm:$0xff] }
 0x143   : > { %v1407_v55 = vmax.f32 %v1349_v42, 0.0 }
 0x144   : > { %v1405_v56 = vmax.f32 %v1341_v51, 0.0 }
 0x145   : > { %v3585_v58 = vpack.i.bf16 %v1407_v55, %v1406_v39 }
 0x146   : > { %v3574_v33 = vpop.f32.mrb[24].mxu0  ;;  %v3587_v59 = vpack.i.bf16 %v1405_v56, %v1404_v49  ;;  %v2822_v61 = vpop.f32.mrb[24].mxu1 }
 0x147   : > { %v3577_v38 = vpop.f32.mrb[25].mxu0  ;;  %v1362_v63 = vadd.f32 %v2822_v61, %v3482_v45  ;;  %v1353_v3 = vpop.f32.mrb[25].mxu1 }
 0x148   : > { %v3580_v46 = vpop.f32.mrb[26].mxu0  ;;  %v1354_v5 = vadd.f32 %v3482_v45, %v1353_v3  ;;  %v2823_v8 = vpop.f32.mrb[26].mxu1 }
 0x149   : > { %v3583_v54 = vpop.f32.mrb[27].mxu0  ;;  %v1410_v12 = vmax.f32 %v1362_v63, 0.0  ;;  %v1365_v13 = vadd.f32 %v2823_v8, %v3482_v45  ;;  %v1356_v14 = vpop.f32.mrb[27].mxu1 }
 0x14a   : > { %v1408_v17 = vmax.f32 %v1354_v5, 0.0  ;;  %v1357_v24 = vadd.f32 %v3482_v45, %v1356_v14 }
 0x14b   : > { %v1411_v29 = vmax.f32 %v1365_v13, 0.0 }
 0x14c   : > { %v1409_v31 = vmax.f32 %v1357_v24, 0.0 }
 0x14d   : > { %v3601_v32 = vpack.i.bf16 %v1411_v29, %v1410_v12 }
 0x14e   : > { %v3590_v4 = vpop.f32.mrb[28].mxu0  ;;  %v3608_v36 = vpack.i.bf16 %v1409_v31, %v1408_v17  ;;  %v2826_v39 = vpop.f32.mrb[28].mxu1 }
 0x14f   : > { %3965 = vst [vmem:[#allocation3_spill] sm:$0xff] %v3590_v4  ;;  %v3593_v10 = vpop.f32.mrb[29].mxu0  ;;  %v1378_v42 = vadd.f32 %v2826_v39, %v3482_v45  ;;  %v1369_v43 = vpop.f32.mrb[29].mxu1 }
 0x150   : > { %v3596_v16 = vpop.f32.mrb[30].mxu0  ;;  %v1370_v51 = vadd.f32 %v3482_v45, %v1369_v43  ;;  %v2827_v55 = vpop.f32.mrb[30].mxu1 }
 0x151   : > { %3966 = vst [vmem:[#allocation4_spill] sm:$0xff] %v3596_v16  ;;  %v3599_v25 = vpop.f32.mrb[31].mxu0  ;;  %v1414_v63 = vmax.f32 %v1378_v42, 0.0  ;;  %v1381_v3 = vadd.f32 %v2827_v55, %v3482_v45  ;;  %v1372_v5 = vpop.f32.mrb[31].mxu1 }
 0x152   : > { %3967 = vst [vmem:[#allocation5_spill] sm:$0xff] %v3599_v25  ;;  %v1412_v13 = vmax.f32 %v1370_v51, 0.0  ;;  %v1373_v14 = vadd.f32 %v3482_v45, %v1372_v5 }
 0x153   : > { %v1415_v29 = vmax.f32 %v1381_v3, 0.0 }
 0x154   : > { %v1413_v39 = vmax.f32 %v1373_v14, 0.0 }
 0x155   : > { %v3618_v16 = vpack.i.bf16 %v1415_v29, %v1414_v63 }
 0x156   : > { %v2836_v49 = vpop.f32.mrb[32].mxu0  ;;  %v3620_v4 = vpack.i.bf16 %v1413_v39, %v1412_v13 }
 0x157   : > { %v1649_v56 = vadd.f32 %v2836_v49, %v3606_v35  ;;  %v1640_v61 = vpop.f32.mrb[33].mxu0 }
 0x158   : > { %v1641_v8 = vadd.f32 %v3606_v35, %v1640_v61  ;;  %v2837_v12 = vpop.f32.mrb[34].mxu0 }
 0x159   : > { %v1652_v17 = vadd.f32 %v2837_v12, %v3606_v35  ;;  %v1643_v24 = vpop.f32.mrb[35].mxu0  ;;  %v1769_v43 = vmax.f32 %v1649_v56, 0.0 }
 0x15a   : > { %v1644_v31 = vadd.f32 %v3606_v35, %v1643_v24  ;;  %v1767_v42 = vmax.f32 %v1641_v8, 0.0 }
 0x15b   : > { %v1770_v49 = vmax.f32 %v1652_v17, 0.0 }
 0x15c   : > { %v1768_v55 = vmax.f32 %v1644_v31, 0.0 }
 0x15d   : > { %v2949_v61 = vpack.i.bf16 %v1770_v49, %v1769_v43 }
 0x15e   : > { %v2840_v25 = vpop.f32.mrb[36].mxu0  ;;  %v2944_v51 = vpack.i.bf16 %v1768_v55, %v1767_v42 }
 0x15f   : > { %v1665_v45 = vadd.f32 %v2840_v25, %v3606_v35  ;;  %v1656_v5 = vpop.f32.mrb[37].mxu0 }
 0x160   : > { %v1657_v12 = vadd.f32 %v3606_v35, %v1656_v5  ;;  %v2841_v3 = vpop.f32.mrb[38].mxu0  ;;  %2945 = vrot.lane.b32.xlu1 %v2944_v51, %s3178_s23 }
 0x161   : > { %v1773_v56 = vmax.f32 %v1665_v45, 0.0  ;;  %v1668_v63 = vadd.f32 %v2841_v3, %v3606_v35  ;;  %v1659_v14 = vpop.f32.mrb[39].mxu0 }
 0x162   : > { %v1771_v8 = vmax.f32 %v1657_v12, 0.0  ;;  %v1660_v13 = vadd.f32 %v3606_v35, %v1659_v14 }
 0x163   : > { %v1774_v17 = vmax.f32 %v1668_v63, 0.0 }
 0x164   : > { %v1772_v24 = vmax.f32 %v1660_v13, 0.0  ;;  %2950 = vrot.lane.b32.xlu1 %v2949_v61, %s3178_s23 }
 0x165   : > { %v2964_v29 = vpack.i.bf16 %v1774_v17, %v1773_v56 }
 0x166   : > { %v2969_v25 = vpack.i.bf16 %v1772_v24, %v1771_v8  ;;  %v2844_v31 = vpop.f32.mrb[40].mxu0 }
 0x167   : > { %v1681_v39 = vadd.f32 %v2844_v31, %v3606_v35  ;;  %v1672_v43 = vpop.f32.mrb[41].mxu0 }
 0x168   : > { %v1673_v49 = vadd.f32 %v3606_v35, %v1672_v43  ;;  %v2845_v42 = vpop.f32.mrb[42].mxu0  ;;  %2970 = vrot.lane.b32.xlu0 %v2969_v25, %s3178_s23  ;;  %2960 = vrot.lane.b32.xlu1 %v3514_v18, %s3177_s15 }
 0x169   : > { %v1777_v55 = vmax.f32 %v1681_v39, 0.0  ;;  %v1684_v51 = vadd.f32 %v2845_v42, %v3606_v35  ;;  %v1675_v45 = vpop.f32.mrb[43].mxu0 }
 0x16a   : > { %v1775_v5 = vmax.f32 %v1673_v49, 0.0  ;;  %v1676_v61 = vadd.f32 %v3606_v35, %v1675_v45 }
 0x16b   : > { %v1778_v12 = vmax.f32 %v1684_v51, 0.0 }
 0x16c   : > { %v1776_v3 = vmax.f32 %v1676_v61, 0.0  ;;  %2975 = vrot.lane.b32.xlu0 %v3539_v41, %s3177_s15  ;;  %2965 = vrot.lane.b32.xlu1 %v2964_v29, %s3178_s23 }
 0x16d   : > { %v2984_v56 = vpack.i.bf16 %v1778_v12, %v1777_v55 }
 0x16e   : > { %v2989_v63 = vpack.i.bf16 %v1776_v3, %v1775_v5  ;;  %v2848_v14 = vpop.f32.mrb[44].mxu0 }
 0x16f   : > { %v1697_v8 = vadd.f32 %v2848_v14, %v3606_v35  ;;  %v1688_v18 = vpop.f32.mrb[45].mxu0 }
 0x170   : > { %v1689_v13 = vadd.f32 %v3606_v35, %v1688_v18  ;;  %v2849_v17 = vpop.f32.mrb[46].mxu0  ;;  %2990 = vrot.lane.b32.xlu0 %v2989_v63, %s3178_s23  ;;  %2980 = vrot.lane.b32.xlu1 %v3537_v40, %s3177_s15 }
 0x171   : > { %v1781_v24 = vmax.f32 %v1697_v8, 0.0  ;;  %v1700_v25 = vadd.f32 %v2849_v17, %v3606_v35  ;;  %v1691_v41 = vpop.f32.mrb[47].mxu0 }
 0x172   : > { %v1779_v31 = vmax.f32 %v1689_v13, 0.0  ;;  %v1692_v29 = vadd.f32 %v3606_v35, %v1691_v41 }
 0x173   : > { %v1782_v39 = vmax.f32 %v1700_v25, 0.0 }
 0x174   : > { %v1780_v43 = vmax.f32 %v1692_v29, 0.0  ;;  %2995 = vrot.lane.b32.xlu0 %v3555_v1, %s3177_s15  ;;  %2985 = vrot.lane.b32.xlu1 %v2984_v56, %s3178_s23 }
 0x175   : > { %v3004_v49 = vpack.i.bf16 %v1782_v39, %v1781_v24 }
 0x176   : > { %v3009_v42 = vpack.i.bf16 %v1780_v43, %v1779_v31  ;;  %v2852_v55 = vpop.f32.mrb[48].mxu0 }
 0x177   : > { %v1713_v51 = vadd.f32 %v2852_v55, %v3606_v35  ;;  %v1704_v40 = vpop.f32.mrb[49].mxu0 }
 0x178   : > { %v1705_v45 = vadd.f32 %v3606_v35, %v1704_v40  ;;  %v2853_v5 = vpop.f32.mrb[50].mxu0  ;;  %3010 = vrot.lane.b32.xlu0 %v3009_v42, %s3178_s23  ;;  %3000 = vrot.lane.b32.xlu1 %v3553_v0, %s3177_s15 }
 0x179   : > { %v1785_v61 = vmax.f32 %v1713_v51, 0.0  ;;  %v1716_v12 = vadd.f32 %v2853_v5, %v3606_v35  ;;  %v1707_v1 = vpop.f32.mrb[51].mxu0 }
 0x17a   : > { %v1783_v3 = vmax.f32 %v1705_v45, 0.0  ;;  %v1708_v56 = vadd.f32 %v3606_v35, %v1707_v1 }
 0x17b   : > { %v1786_v63 = vmax.f32 %v1716_v12, 0.0 }
 0x17c   : > { %v1784_v14 = vmax.f32 %v1708_v56, 0.0  ;;  %3015 = vrot.lane.b32.xlu0 %v3571_v28, %s3177_s15  ;;  %3005 = vrot.lane.b32.xlu1 %v3004_v49, %s3178_s23 }
 0x17d   : > { %v3024_v8 = vpack.i.bf16 %v1786_v63, %v1785_v61 }
 0x17e   : > { %v3029_v18 = vpack.i.bf16 %v1784_v14, %v1783_v3  ;;  %v2856_v13 = vpop.f32.mrb[52].mxu0 }
 0x17f   : > { %v1729_v17 = vadd.f32 %v2856_v13, %v3606_v35  ;;  %v1720_v0 = vpop.f32.mrb[53].mxu0 }
 0x180   : > { %v1721_v24 = vadd.f32 %v3606_v35, %v1720_v0  ;;  %v2857_v25 = vpop.f32.mrb[54].mxu0  ;;  %3030 = vrot.lane.b32.xlu0 %v3029_v18, %s3178_s23  ;;  %3020 = vrot.lane.b32.xlu1 %v3569_v26, %s3177_s15 }
 0x181   : > { %v1789_v41 = vmax.f32 %v1729_v17, 0.0  ;;  %v1732_v31 = vadd.f32 %v2857_v25, %v3606_v35  ;;  %v1723_v28 = vpop.f32.mrb[55].mxu0 }
 0x182   : > { %v1787_v29 = vmax.f32 %v1721_v24, 0.0  ;;  %v1724_v39 = vadd.f32 %v3606_v35, %v1723_v28 }
 0x183   : > { %v1790_v43 = vmax.f32 %v1732_v31, 0.0 }
 0x184   : > { %v1788_v49 = vmax.f32 %v1724_v39, 0.0  ;;  %3035 = vrot.lane.b32.xlu0 %v3587_v59, %s3177_s15  ;;  %3025 = vrot.lane.b32.xlu1 %v3024_v8, %s3178_s23 }
 0x185   : > { %v3044_v42 = vpack.i.bf16 %v1790_v43, %v1789_v41 }
 0x186   : > { %v3049_v55 = vpack.i.bf16 %v1788_v49, %v1787_v29  ;;  %v2860_v51 = vpop.f32.mrb[56].mxu0 }
 0x187   : > { %v1745_v40 = vadd.f32 %v2860_v51, %v3606_v35  ;;  %v1736_v26 = vpop.f32.mrb[57].mxu0 }
 0x188   : > { %v1737_v45 = vadd.f32 %v3606_v35, %v1736_v26  ;;  %v2861_v5 = vpop.f32.mrb[58].mxu0  ;;  %3050 = vrot.lane.b32.xlu0 %v3049_v55, %s3178_s23  ;;  %3040 = vrot.lane.b32.xlu1 %v3585_v58, %s3177_s15 }
 0x189   : > { %v1793_v61 = vmax.f32 %v1745_v40, 0.0  ;;  %v1748_v12 = vadd.f32 %v2861_v5, %v3606_v35  ;;  %v1739_v59 = vpop.f32.mrb[59].mxu0 }
 0x18a   : > { %v1791_v1 = vmax.f32 %v1737_v45, 0.0  ;;  %v1740_v3 = vadd.f32 %v3606_v35, %v1739_v59 }
 0x18b   : > { %v1794_v56 = vmax.f32 %v1748_v12, 0.0 }
 0x18c   : > { %v1792_v63 = vmax.f32 %v1740_v3, 0.0  ;;  %3055 = vrot.lane.b32.xlu0 %v3608_v36, %s3177_s15  ;;  %3045 = vrot.lane.b32.xlu1 %v3044_v42, %s3178_s23 }
 0x18d   : > { %v3064_v14 = vpack.i.bf16 %v1794_v56, %v1793_v61 }
 0x18e   : > { %v3069_v8 = vpack.i.bf16 %v1792_v63, %v1791_v1  ;;  %v2864_v18 = vpop.f32.mrb[60].mxu0 }
 0x18f   : > { %v1761_v13 = vadd.f32 %v2864_v18, %v3606_v35  ;;  %v1752_v58 = vpop.f32.mrb[61].mxu0 }
 0x190   : > { %v1753_v17 = vadd.f32 %v3606_v35, %v1752_v58  ;;  %v2865_v0 = vpop.f32.mrb[62].mxu0  ;;  %3070 = vrot.lane.b32.xlu0 %v3069_v8, %s3178_s23  ;;  %3060 = vrot.lane.b32.xlu1 %v3601_v32, %s3177_s15 }
 0x191   : > { %v1797_v24 = vmax.f32 %v1761_v13, 0.0  ;;  %v1764_v25 = vadd.f32 %v2865_v0, %v3606_v35  ;;  %v1755_v36 = vpop.f32.mrb[63].mxu0 }
 0x192   : > { %v1795_v41 = vmax.f32 %v1753_v17, 0.0  ;;  %v1756_v31 = vadd.f32 %v3606_v35, %v1755_v36  ;;  %v2936_v32 = vpop.permute.xlu0 %2935  ;;  %v3695_v35 = vld [vmem:[%s3961_s2] ss:$0 sm:$0xff] }
 0x193   : > { %v1798_v28 = vmax.f32 %v1764_v25, 0.0  ;;  %v878_v49 = vadd.f32 %v3695_v35, %v3490_v53  ;;  %v2938_v55 = vunpack.i.h.bf16 %v2936_v32  ;;  %v2937_v51 = vunpack.i.l.bf16 %v2936_v32 }
 0x194   : > { %v1796_v29 = vmax.f32 %v1756_v31, 0.0  ;;  %3075 = vrot.lane.b32.xlu0 %v3620_v4, %s3177_s15  ;;  %3065 = vrot.lane.b32.xlu1 %v3064_v14, %s3178_s23  ;;  %v875_v4 = vadd.f32 %v3695_v35, %v3484_v47  ;;  %v886_v26 = vadd.f32 %v3487_v50, %v3695_v35  ;;  %v891_v50 = vadd.f32 %v3695_v35, %v3502_v2 }
 0x195   : > { %v3089_v39 = vpack.i.bf16 %v1798_v28, %v1797_v24  ;;  %v1002_v45 = vmax.f32 %v878_v49, 0.0  ;;  %v894_v8 = vadd.f32 %v3695_v35, %v3509_v9  ;;  %v902_v28 = vadd.f32 %v3505_v6, %v3695_v35 }
 0x196   : > { %v3084_v43 = vpack.i.bf16 %v1796_v29, %v1795_v41  ;;  %v2941_v42 = vpop.permute.xlu0 %2940  ;;  %v1001_v40 = vmax.f32 %v875_v4, 0.0  ;;  %v1004_v14 = vmax.f32 %v886_v26, 0.0  ;;  %v899_v41 = vadd.f32 %v3494_v62, %v3695_v35 }
 0x197   : > { %v2057_v53 = vsel %vm2055_vm3, %v1002_v45, %v2938_v55  ;;  %v2943_v59 = vunpack.i.h.bf16 %v2941_v42  ;;  %v2942_v1 = vunpack.i.l.bf16 %v2941_v42  ;;  %v1005_v9 = vmax.f32 %v891_v50, 0.0 }
 0x198   : > { %3085 = vrot.lane.b32.xlu0 %v3084_v43, %s3178_s23  ;;  %3080 = vrot.lane.b32.xlu1 %v3618_v16, %s3177_s15  ;;  %v883_v16 = vadd.f32 %v3477_v44, %v3695_v35  ;;  %v2056_v47 = vsel %vm2055_vm3, %v1001_v40, %v2937_v51  ;;  %v1006_v29 = vmax.f32 %v894_v8, 0.0  ;;  %v1008_v6 = vmax.f32 %v902_v28, 0.0 }
 0x199   : > { %v2059_v24 = vsel %vm2055_vm3, %v1004_v14, %v2943_v59  ;;  %v907_v45 = vadd.f32 %v3695_v35, %v3518_v21  ;;  %v918_v50 = vadd.f32 %v3520_v22, %v3695_v35  ;;  %v926_v28 = vadd.f32 %v3695_v35, %v3535_v37 }
 0x19a   : > { %v1003_v3 = vmax.f32 %v883_v16, 0.0  ;;  %v2956_v56 = vpop.permute.xlu0 %2955  ;;  %v1007_v16 = vmax.f32 %v899_v41, 0.0 }
 0x19b   : > { %v2958_v25 = vunpack.i.h.bf16 %v2956_v56  ;;  %v2957_v36 = vunpack.i.l.bf16 %v2956_v56  ;;  %v1009_v14 = vmax.f32 %v907_v45, 0.0  ;;  %v1012_v22 = vmax.f32 %v918_v50, 0.0 }
 0x19c   : > { %3090 = vrot.lane.b32.xlu1 %v3089_v39, %s3178_s23  ;;  %v2058_v0 = vsel %vm2055_vm3, %v1003_v3, %v2942_v1 }
 0x19d   : > { %v2060_v42 = vsel %vm2055_vm3, %v1005_v9, %v2957_v36  ;;  %v2061_v55 = vsel %vm2055_vm3, %v1006_v29, %v2958_v25  ;;  %v923_v9 = vadd.f32 %v3695_v35, %v3529_v30 }
 0x1d2   : > { %v2946_v5 = vpop.permute.xlu1 %2945 }
 0x1d3   : > { %v2948_v61 = vunpack.i.h.bf16 %v2946_v5  ;;  %v2947_v12 = vunpack.i.l.bf16 %v2946_v5  ;;  %v910_v5 = vadd.f32 %v3695_v35, %v3523_v23 }
 0x1d5   : > { %v2089_v44 = vsel %vm2088_vm4, %v2056_v47, %v2947_v12  ;;  %v2090_v63 = vsel %vm2088_vm4, %v2057_v53, %v2948_v61  ;;  %v1010_v8 = vmax.f32 %v910_v5, 0.0 }
 0x1d6   : > { %v2121_v18 = vpack.c.bf16 %v2090_v63, %v2089_v44  ;;  %v2951_v13 = vpop.permute.xlu1 %2950  ;;  %v915_v63 = vadd.f32 %v3516_v19, %v3695_v35 }
 0x1d7   : > { %v2953_v58 = vunpack.i.h.bf16 %v2951_v13  ;;  %v2952_v17 = vunpack.i.l.bf16 %v2951_v13 }
 0x1d8   : > { %2870 = vmatprep.mubr.msk.bf16.mxu1 %vm2156_vm5, %v2121_v18  ;;  %v1011_v41 = vmax.f32 %v915_v63, 0.0  ;;  %v942_v63 = vadd.f32 %v3695_v35, %v3551_v60 }
 0x1d9   : > { %v2092_v2 = vsel %vm2088_vm4, %v2059_v24, %v2953_v58  ;;  %v2091_v31 = vsel %vm2088_vm4, %v2058_v0, %v2952_v17 }
 0x1da   : > { %v2122_v39 = vpack.c.bf16 %v2092_v2, %v2091_v31  ;;  %v2971_v43 = vpop.permute.xlu0 %2970  ;;  %v2961_v32 = vpop.permute.xlu1 %2960 }
 0x1db   : > { %v2973_v4 = vunpack.i.h.bf16 %v2971_v43  ;;  %v2972_v49 = vunpack.i.l.bf16 %v2971_v43  ;;  %v2963_v51 = vunpack.i.h.bf16 %v2961_v32  ;;  %v2962_v62 = vunpack.i.l.bf16 %v2961_v32 }
 0x1dc   : > { %2871 = vmatmul.mubr.msk.bf16.vlgmr.msra.gmra.mrb[32].mxu1 %vm2156_vm5, %v2122_v39 }
 0x1dd   : > { %v2093_v40 = vsel %vm2088_vm4, %v2060_v42, %v2972_v49  ;;  %v2094_v26 = vsel %vm2088_vm4, %v2061_v55, %v2973_v4  ;;  %v2063_v1 = vsel %vm2055_vm3, %v1008_v6, %v2963_v51  ;;  %v2062_v3 = vsel %vm2055_vm3, %v1007_v16, %v2962_v62 }
 0x1de   : > { %v2123_v61 = vpack.c.bf16 %v2094_v26, %v2093_v40  ;;  %v2976_v12 = vpop.permute.xlu0 %2975  ;;  %v2966_v47 = vpop.permute.xlu1 %2965  ;;  %v931_v62 = vadd.f32 %v3526_v27, %v3695_v35  ;;  %v1013_v16 = vmax.f32 %v923_v9, 0.0  ;;  %v934_v40 = vadd.f32 %v3532_v34, %v3695_v35 }
 0x1df   : > { %v2968_v53 = vunpack.i.h.bf16 %v2966_v47  ;;  %v2967_v59 = vunpack.i.l.bf16 %v2966_v47  ;;  %v2978_v56 = vunpack.i.h.bf16 %v2976_v12  ;;  %v2977_v44 = vunpack.i.l.bf16 %v2976_v12 }
 0x1e0   : > { %2874 = vmatprep.mubr.msk.bf16.mxu1 %vm2156_vm5, %v2123_v61  ;;  %v1014_v26 = vmax.f32 %v926_v28, 0.0  ;;  %v1016_v34 = vmax.f32 %v934_v40, 0.0 }
 0x1e1   : > { %v2095_v21 = vsel %vm2088_vm4, %v2062_v3, %v2967_v59  ;;  %v2096_v23 = vsel %vm2088_vm4, %v2063_v1, %v2968_v53  ;;  %v2064_v24 = vsel %vm2055_vm3, %v1009_v14, %v2977_v44  ;;  %v2065_v25 = vsel %vm2055_vm3, %v1010_v8, %v2978_v56 }
 0x1e2   : > { %v2124_v18 = vpack.c.bf16 %v2096_v23, %v2095_v21  ;;  %v2991_v13 = vpop.permute.xlu0 %2990  ;;  %v2981_v58 = vpop.permute.xlu1 %2980  ;;  %v1015_v1 = vmax.f32 %v931_v62, 0.0  ;;  %v939_v44 = vadd.f32 %v3695_v35, %v3545_v52 }
 0x1e3   : > { %v2993_v17 = vunpack.i.h.bf16 %v2991_v13  ;;  %v2992_v0 = vunpack.i.l.bf16 %v2991_v13  ;;  %v2983_v36 = vunpack.i.h.bf16 %v2981_v58  ;;  %v2982_v19 = vunpack.i.l.bf16 %v2981_v58 }
 0x1e4   : > { %2875 = vmatmul.mubr.msk.bf16.gmra.mrb[36].mxu1 %vm2156_vm5, %v2124_v18 }
 0x1e5   : > { %v2097_v2 = vsel %vm2088_vm4, %v2064_v24, %v2992_v0  ;;  %v2098_v31 = vsel %vm2088_vm4, %v2065_v25, %v2993_v17  ;;  %v2067_v49 = vsel %vm2055_vm3, %v1012_v22, %v2983_v36  ;;  %v2066_v42 = vsel %vm2055_vm3, %v1011_v41, %v2982_v19 }
 0x1e6   : > { %v2125_v29 = vpack.c.bf16 %v2098_v31, %v2097_v2  ;;  %v2996_v39 = vpop.permute.xlu0 %2995  ;;  %v2986_v43 = vpop.permute.xlu1 %2985  ;;  %v947_v0 = vadd.f32 %v3542_v48, %v3695_v35  ;;  %v1017_v24 = vmax.f32 %v939_v44, 0.0  ;;  %v950_v25 = vadd.f32 %v3548_v57, %v3695_v35 }
 0x1e7   : > { %v2988_v32 = vunpack.i.h.bf16 %v2986_v43  ;;  %v2987_v4 = vunpack.i.l.bf16 %v2986_v43  ;;  %v2998_v55 = vunpack.i.h.bf16 %v2996_v39  ;;  %v2997_v51 = vunpack.i.l.bf16 %v2996_v39 }
 0x1e8   : > { %2878 = vmatprep.mubr.msk.bf16.mxu1 %vm2156_vm5, %v2125_v29  ;;  %v1018_v36 = vmax.f32 %v942_v63, 0.0  ;;  %v1019_v39 = vmax.f32 %v947_v0, 0.0  ;;  %v1020_v57 = vmax.f32 %v950_v25, 0.0  ;;  %v982_v25 = vadd.f32 %v3580_v46, %v3695_v35 }
 0x1e9   : > { %v2099_v30 = vsel %vm2088_vm4, %v2066_v42, %v2987_v4  ;;  %v2100_v37 = vsel %vm2088_vm4, %v2067_v49, %v2988_v32  ;;  %v2068_v47 = vsel %vm2055_vm3, %v1013_v16, %v2997_v51  ;;  %v2069_v53 = vsel %vm2055_vm3, %v1014_v26, %v2998_v55 }
 0x1ea   : > { %v2126_v6 = vpack.c.bf16 %v2100_v37, %v2099_v30  ;;  %v3011_v45 = vpop.permute.xlu0 %3010  ;;  %v3001_v5 = vpop.permute.xlu1 %3000  ;;  %v955_v4 = vadd.f32 %v3695_v35, %v3561_v11  ;;  %v958_v49 = vadd.f32 %v3695_v35, %v3567_v20  ;;  %v1028_v46 = vmax.f32 %v982_v25, 0.0 }
 0x1eb   : > { %v3013_v61 = vunpack.i.h.bf16 %v3011_v45  ;;  %v3012_v12 = vunpack.i.l.bf16 %v3011_v45  ;;  %v3003_v59 = vunpack.i.h.bf16 %v3001_v5  ;;  %v3002_v27 = vunpack.i.l.bf16 %v3001_v5 }
 0x1ec   : > { %2879 = vmatmul.mubr.msk.bf16.gmra.mrb[40].mxu1 %vm2156_vm5, %v2126_v6  ;;  %v963_v6 = vadd.f32 %v3558_v7, %v3695_v35  ;;  %v1021_v45 = vmax.f32 %v955_v4, 0.0  ;;  %v966_v5 = vadd.f32 %v3564_v15, %v3695_v35 }
 0x1ed   : > { %v2101_v3 = vsel %vm2088_vm4, %v2068_v47, %v3012_v12  ;;  %v2102_v56 = vsel %vm2088_vm4, %v2069_v53, %v3013_v61  ;;  %v2071_v18 = vsel %vm2055_vm3, %v1016_v34, %v3003_v59  ;;  %v2070_v13 = vsel %vm2055_vm3, %v1015_v1, %v3002_v27 }
 0x1ee   : > { %v2127_v21 = vpack.c.bf16 %v2102_v56, %v2101_v3  ;;  %v3016_v23 = vpop.permute.xlu0 %3015  ;;  %v3006_v14 = vpop.permute.xlu1 %3005  ;;  %v1022_v61 = vmax.f32 %v958_v49, 0.0  ;;  %v1023_v34 = vmax.f32 %v963_v6, 0.0  ;;  %v1024_v15 = vmax.f32 %v966_v5, 0.0 }
 0x1ef   : > { %v3008_v50 = vunpack.i.h.bf16 %v3006_v14  ;;  %v3007_v8 = vunpack.i.l.bf16 %v3006_v14  ;;  %v3018_v58 = vunpack.i.h.bf16 %v3016_v23  ;;  %v3017_v17 = vunpack.i.l.bf16 %v3016_v23 }
 0x1f0   : > { %2882 = vmatprep.mubr.msk.bf16.mxu1 %vm2156_vm5, %v2127_v21  ;;  %v971_v21 = vadd.f32 %v3695_v35, %v3577_v38  ;;  %v974_v23 = vadd.f32 %v3695_v35, %v3583_v54 }
 0x1f1   : > { %v2103_v52 = vsel %vm2088_vm4, %v2070_v13, %v3007_v8  ;;  %v2104_v60 = vsel %vm2088_vm4, %v2071_v18, %v3008_v50  ;;  %v2072_v9 = vsel %vm2055_vm3, %v1017_v24, %v3017_v17  ;;  %v2073_v28 = vsel %vm2055_vm3, %v1018_v36, %v3018_v58 }
 0x1f2   : > { %v2128_v19 = vpack.c.bf16 %v2104_v60, %v2103_v52  ;;  %v3031_v41 = vpop.permute.xlu0 %3030  ;;  %v3021_v2 = vpop.permute.xlu1 %3020  ;;  %v979_v60 = vadd.f32 %v3574_v33, %v3695_v35  ;;  %v1025_v24 = vmax.f32 %v971_v21, 0.0  ;;  %v1026_v36 = vmax.f32 %v974_v23, 0.0 }
 0x1f3   : > { %v3033_v31 = vunpack.i.h.bf16 %v3031_v41  ;;  %v3032_v22 = vunpack.i.l.bf16 %v3031_v41  ;;  %v3023_v29 = vunpack.i.h.bf16 %v3021_v2  ;;  %v3022_v48 = vunpack.i.l.bf16 %v3021_v2 }
 0x1f4   : > { %2883 = vmatmul.mubr.msk.bf16.gmra.mrb[44].mxu1 %vm2156_vm5, %v2128_v19 }
 0x1f5   : > { %v2105_v43 = vsel %vm2088_vm4, %v2072_v9, %v3032_v22  ;;  %v2106_v32 = vsel %vm2088_vm4, %v2073_v28, %v3033_v31  ;;  %v2075_v37 = vsel %vm2055_vm3, %v1020_v57, %v3023_v29  ;;  %v2074_v16 = vsel %vm2055_vm3, %v1019_v39, %v3022_v48  ;;  %v3968_v57 = vld [vmem:[#allocation5_spill] sm:$0xff] }
 0x1f6   : > { %v2129_v42 = vpack.c.bf16 %v2106_v32, %v2105_v43  ;;  %v3036_v55 = vpop.permute.xlu0 %3035  ;;  %v3026_v51 = vpop.permute.xlu1 %3025  ;;  %v1027_v48 = vmax.f32 %v979_v60, 0.0  ;;  %v987_v32 = vadd.f32 %v3695_v35, %v3593_v10  ;;  %v990_v4 = vadd.f32 %v3695_v35, %v3968_v57 }
 0x1f7   : > { %v3028_v62 = vunpack.i.h.bf16 %v3026_v51  ;;  %v3027_v30 = vunpack.i.l.bf16 %v3026_v51  ;;  %v3038_v40 = vunpack.i.h.bf16 %v3036_v55  ;;  %v3037_v26 = vunpack.i.l.bf16 %v3036_v55 }
 0x1f8   : > { %2886 = vmatprep.mubr.msk.bf16.mxu1 %vm2156_vm5, %v2129_v42 }
 0x1f9   : > { %v2107_v11 = vsel %vm2088_vm4, %v2074_v16, %v3027_v30  ;;  %v2108_v20 = vsel %vm2088_vm4, %v2075_v37, %v3028_v62  ;;  %v2076_v1 = vsel %vm2055_vm3, %v1021_v45, %v3037_v26  ;;  %v2077_v3 = vsel %vm2055_vm3, %v1022_v61, %v3038_v40  ;;  %v3969_v26 = vld [vmem:[#allocation3_spill] sm:$0xff]  ;;  %v3970_v45 = vld [vmem:[#allocation4_spill] sm:$0xff] }
 0x1fa   : > { %v2130_v12 = vpack.c.bf16 %v2108_v20, %v2107_v11  ;;  %v3051_v47 = vpop.permute.xlu0 %3050  ;;  %v3041_v53 = vpop.permute.xlu1 %3040  ;;  %v995_v6 = vadd.f32 %v3969_v26, %v3695_v35  ;;  %v1029_v20 = vmax.f32 %v987_v32, 0.0  ;;  %v998_v5 = vadd.f32 %v3970_v45, %v3695_v35 }
 0x1fb   : > { %v3053_v59 = vunpack.i.h.bf16 %v3051_v47  ;;  %v3052_v27 = vunpack.i.l.bf16 %v3051_v47  ;;  %v3043_v56 = vunpack.i.h.bf16 %v3041_v53  ;;  %v3042_v7 = vunpack.i.l.bf16 %v3041_v53 }
 0x1fc   : > { %2887 = vmatmul.mubr.msk.bf16.gmra.mrb[48].mxu1 %vm2156_vm5, %v2130_v12  ;;  %v1030_v61 = vmax.f32 %v990_v4, 0.0  ;;  %v1031_v35 = vmax.f32 %v995_v6, 0.0 }
 0x1fd   : > { %v2109_v44 = vsel %vm2088_vm4, %v2076_v1, %v3052_v27  ;;  %v2110_v63 = vsel %vm2088_vm4, %v2077_v3, %v3053_v59  ;;  %v2079_v58 = vsel %vm2055_vm3, %v1024_v15, %v3043_v56  ;;  %v2078_v17 = vsel %vm2055_vm3, %v1023_v34, %v3042_v7 }
 0x1fe   : > { %v2131_v14 = vpack.c.bf16 %v2110_v63, %v2109_v44  ;;  %v3056_v50 = vpop.permute.xlu0 %3055  ;;  %v3046_v8 = vpop.permute.xlu1 %3045  ;;  %v1032_v63 = vmax.f32 %v998_v5, 0.0 }
 0x1ff   : > { %v3048_v18 = vunpack.i.h.bf16 %v3046_v8  ;;  %v3047_v13 = vunpack.i.l.bf16 %v3046_v8  ;;  %v3058_v0 = vunpack.i.h.bf16 %v3056_v50  ;;  %v3057_v52 = vunpack.i.l.bf16 %v3056_v50 }
 0x200   : > { %2890 = vmatprep.mubr.msk.bf16.mxu1 %vm2156_vm5, %v2131_v14 }
 0x201   : > { %v2111_v38 = vsel %vm2088_vm4, %v2078_v17, %v3047_v13  ;;  %v2112_v54 = vsel %vm2088_vm4, %v2079_v58, %v3048_v18  ;;  %v2080_v9 = vsel %vm2055_vm3, %v1025_v24, %v3057_v52  ;;  %v2081_v28 = vsel %vm2055_vm3, %v1026_v36, %v3058_v0  ;;  %v3846_v17 = vld [vmem:[%s3963_s4] ss:$0 sm:$0xff] }
 0x202   : > { %v2132_v19 = vpack.c.bf16 %v2112_v54, %v2111_v38  ;;  %v3071_v41 = vpop.permute.xlu0 %3070  ;;  %v3061_v2 = vpop.permute.xlu1 %3060 }
 0x203   : > { %v3073_v31 = vunpack.i.h.bf16 %v3071_v41  ;;  %v3072_v22 = vunpack.i.l.bf16 %v3071_v41  ;;  %v3063_v29 = vunpack.i.h.bf16 %v3061_v2  ;;  %v3062_v33 = vunpack.i.l.bf16 %v3061_v2 }
 0x204   : > { %2891 = vmatmul.mubr.msk.bf16.gmra.mrb[52].mxu1 %vm2156_vm5, %v2132_v19 }
 0x205   : > { %v2113_v39 = vsel %vm2088_vm4, %v2080_v9, %v3072_v22  ;;  %v2114_v43 = vsel %vm2088_vm4, %v2081_v28, %v3073_v31  ;;  %v2083_v30 = vsel %vm2055_vm3, %v1028_v46, %v3063_v29  ;;  %v2082_v37 = vsel %vm2055_vm3, %v1027_v48, %v3062_v33 }
 0x206   : > { %v2133_v49 = vpack.c.bf16 %v2114_v43, %v2113_v39  ;;  %v3076_v42 = vpop.permute.xlu0 %3075  ;;  %v3066_v55 = vpop.permute.xlu1 %3065 }
 0x207   : > { %v3068_v51 = vunpack.i.h.bf16 %v3066_v55  ;;  %v3067_v62 = vunpack.i.l.bf16 %v3066_v55  ;;  %v3078_v16 = vunpack.i.h.bf16 %v3076_v42  ;;  %v3077_v40 = vunpack.i.l.bf16 %v3076_v42 }
 0x208   : > { %2894 = vmatprep.mubr.msk.bf16.mxu1 %vm2156_vm5, %v2133_v49 }
 0x209   : > { %v2115_v10 = vsel %vm2088_vm4, %v2082_v37, %v3067_v62  ;;  %v2116_v11 = vsel %vm2088_vm4, %v2083_v30, %v3068_v51  ;;  %v2084_v1 = vsel %vm2055_vm3, %v1029_v20, %v3077_v40  ;;  %v2085_v3 = vsel %vm2055_vm3, %v1030_v61, %v3078_v16 }
 0x20a   : > { %v2134_v12 = vpack.c.bf16 %v2116_v11, %v2115_v10  ;;  %v3086_v47 = vpop.permute.xlu0 %3085  ;;  %v3081_v53 = vpop.permute.xlu1 %3080 }
 0x20b   : > { %v3088_v59 = vunpack.i.h.bf16 %v3086_v47  ;;  %v3087_v27 = vunpack.i.l.bf16 %v3086_v47  ;;  %v3083_v56 = vunpack.i.h.bf16 %v3081_v53  ;;  %v3082_v7 = vunpack.i.l.bf16 %v3081_v53 }
 0x20c   : > { %2895 = vmatmul.mubr.msk.bf16.gmra.mrb[56].mxu1 %vm2156_vm5, %v2134_v12 }
 0x20d   : > { %v2117_v34 = vsel %vm2088_vm4, %v2084_v1, %v3087_v27  ;;  %v2118_v44 = vsel %vm2088_vm4, %v2085_v3, %v3088_v59  ;;  %v2087_v50 = vsel %vm2055_vm3, %v1032_v63, %v3083_v56  ;;  %v2086_v8 = vsel %vm2055_vm3, %v1031_v35, %v3082_v7 }
 0x20e   : > { %v2135_v15 = vpack.c.bf16 %v2118_v44, %v2117_v34  ;;  %v3091_v21 = vpop.permute.xlu1 %3090 }
 0x20f   : > { %v3093_v23 = vunpack.i.h.bf16 %v3091_v21  ;;  %v3092_v14 = vunpack.i.l.bf16 %v3091_v21 }
 0x210   : > { %2898 = vmatprep.mubr.msk.bf16.mxu1 %vm2156_vm5, %v2135_v15 }
 0x211   : > { %v2119_v18 = vsel %vm2088_vm4, %v2086_v8, %v3092_v14  ;;  %v2120_v13 = vsel %vm2088_vm4, %v2087_v50, %v3093_v23 }
 0x212   : > { %v2136_v58 = vpack.c.bf16 %v2120_v13, %v2119_v18 }
 0x214   : > { %2899 = vmatmul.mubr.msk.bf16.gmra.mrb[60].mxu1 %vm2156_vm5, %v2136_v58 }
 0x2af   : > { %v2872_v0 = vpop.f32.mrb[32].mxu1 }
 0x2b0   : > { %v2252_v52 = vadd.f32 %v2872_v0, %v3846_v17  ;;  %v2243_v60 = vpop.f32.mrb[33].mxu1 }
 0x2b1   : > { %v2244_v38 = vadd.f32 %v3846_v17, %v2243_v60  ;;  %v2873_v54 = vpop.f32.mrb[34].mxu1 }
 0x2b2   : > { %2372 = vst.msk [vmem:[%s3851_s7 + $0x10] sm:$0xff] %vm2055_vm3, %v2252_v52  ;;  %v2255_v24 = vadd.f32 %v2873_v54, %v3846_v17  ;;  %v2246_v25 = vpop.f32.mrb[35].mxu1 }
 0x2b3   : > { %2370 = vst.msk [vmem:[%s3851_s7] sm:$0xff] %vm2055_vm3, %v2244_v38  ;;  %v2247_v36 = vadd.f32 %v3846_v17, %v2246_v25 }
 0x2b4   : > { %2373 = vst.msk [vmem:[%s3851_s7 + $0x18] sm:$0xff] %vm2055_vm3, %v2255_v24 }
 0x2b5   : > { %2371 = vst.msk [vmem:[%s3851_s7 + $0x8] sm:$0xff] %vm2055_vm3, %v2247_v36 }
 0x2b7   : > { %v2876_v19 = vpop.f32.mrb[36].mxu1 }
 0x2b8   : > { %v2268_v41 = vadd.f32 %v2876_v19, %v3846_v17  ;;  %v2259_v2 = vpop.f32.mrb[37].mxu1 }
 0x2b9   : > { %v2260_v31 = vadd.f32 %v3846_v17, %v2259_v2  ;;  %v2877_v22 = vpop.f32.mrb[38].mxu1 }
 0x2ba   : > { %2376 = vst.msk [vmem:[%s3851_s7 + $0x30] sm:$0xff] %vm2055_vm3, %v2268_v41  ;;  %v2271_v9 = vadd.f32 %v2877_v22, %v3846_v17  ;;  %v2262_v28 = vpop.f32.mrb[39].mxu1 }
 0x2bb   : > { %2374 = vst.msk [vmem:[%s3851_s7 + $0x20] sm:$0xff] %vm2055_vm3, %v2260_v31  ;;  %v2263_v29 = vadd.f32 %v3846_v17, %v2262_v28 }
 0x2bc   : > { %2377 = vst.msk [vmem:[%s3851_s7 + $0x38] sm:$0xff] %vm2055_vm3, %v2271_v9 }
 0x2bd   : > { %2375 = vst.msk [vmem:[%s3851_s7 + $0x28] sm:$0xff] %vm2055_vm3, %v2263_v29 }
 0x2bf   : > { %v2880_v33 = vpop.f32.mrb[40].mxu1 }
 0x2c0   : > { %v2284_v48 = vadd.f32 %v2880_v33, %v3846_v17  ;;  %v2275_v39 = vpop.f32.mrb[41].mxu1 }
 0x2c1   : > { %v2276_v43 = vadd.f32 %v3846_v17, %v2275_v39  ;;  %v2881_v46 = vpop.f32.mrb[42].mxu1 }
 0x2c2   : > { %2380 = vst.msk [vmem:[%s3851_s7 + $0x50] sm:$0xff] %vm2055_vm3, %v2284_v48  ;;  %v2287_v32 = vadd.f32 %v2881_v46, %v3846_v17  ;;  %v2278_v57 = vpop.f32.mrb[43].mxu1 }
 0x2c3   : > { %2378 = vst.msk [vmem:[%s3851_s7 + $0x40] sm:$0xff] %vm2055_vm3, %v2276_v43  ;;  %v2279_v4 = vadd.f32 %v3846_v17, %v2278_v57 }
 0x2c4   : > { %2381 = vst.msk [vmem:[%s3851_s7 + $0x58] sm:$0xff] %vm2055_vm3, %v2287_v32 }
 0x2c5   : > { %2379 = vst.msk [vmem:[%s3851_s7 + $0x48] sm:$0xff] %vm2055_vm3, %v2279_v4 }
 0x2c7   : > { %v2884_v49 = vpop.f32.mrb[44].mxu1 }
 0x2c8   : > { %v2300_v42 = vadd.f32 %v2884_v49, %v3846_v17  ;;  %v2291_v55 = vpop.f32.mrb[45].mxu1 }
 0x2c9   : > { %v2292_v51 = vadd.f32 %v3846_v17, %v2291_v55  ;;  %v2885_v62 = vpop.f32.mrb[46].mxu1 }
 0x2ca   : > { %2384 = vst.msk [vmem:[%s3851_s7 + $0x70] sm:$0xff] %vm2055_vm3, %v2300_v42  ;;  %v2303_v30 = vadd.f32 %v2885_v62, %v3846_v17  ;;  %v2294_v37 = vpop.f32.mrb[47].mxu1 }
 0x2cb   : > { %2382 = vst.msk [vmem:[%s3851_s7 + $0x60] sm:$0xff] %vm2055_vm3, %v2292_v51  ;;  %v2295_v16 = vadd.f32 %v3846_v17, %v2294_v37 }
 0x2cc   : > { %2385 = vst.msk [vmem:[%s3851_s7 + $0x78] sm:$0xff] %vm2055_vm3, %v2303_v30 }
 0x2cd   : > { %2383 = vst.msk [vmem:[%s3851_s7 + $0x68] sm:$0xff] %vm2055_vm3, %v2295_v16 }
 0x2cf   : > { %v2888_v40 = vpop.f32.mrb[48].mxu1 }
 0x2d0   : > { %v2316_v26 = vadd.f32 %v2888_v40, %v3846_v17  ;;  %v2307_v6 = vpop.f32.mrb[49].mxu1 }
 0x2d1   : > { %v2308_v10 = vadd.f32 %v3846_v17, %v2307_v6  ;;  %v2889_v11 = vpop.f32.mrb[50].mxu1 }
 0x2d2   : > { %2388 = vst.msk [vmem:[%s3851_s7 + $0x90] sm:$0xff] %vm2055_vm3, %v2316_v26  ;;  %v2319_v20 = vadd.f32 %v2889_v11, %v3846_v17  ;;  %v2310_v45 = vpop.f32.mrb[51].mxu1 }
 0x2d3   : > { %2386 = vst.msk [vmem:[%s3851_s7 + $0x80] sm:$0xff] %vm2055_vm3, %v2308_v10  ;;  %v2311_v5 = vadd.f32 %v3846_v17, %v2310_v45 }
 0x2d4   : > { %2389 = vst.msk [vmem:[%s3851_s7 + $0x98] sm:$0xff] %vm2055_vm3, %v2319_v20 }
 0x2d5   : > { %2387 = vst.msk [vmem:[%s3851_s7 + $0x88] sm:$0xff] %vm2055_vm3, %v2311_v5 }
 0x2d7   : > { %v2892_v61 = vpop.f32.mrb[52].mxu1 }
 0x2d8   : > { %v2332_v12 = vadd.f32 %v2892_v61, %v3846_v17  ;;  %v2323_v47 = vpop.f32.mrb[53].mxu1 }
 0x2d9   : > { %v2324_v53 = vadd.f32 %v3846_v17, %v2323_v47  ;;  %v2893_v59 = vpop.f32.mrb[54].mxu1 }
 0x2da   : > { %2392 = vst.msk [vmem:[%s3851_s7 + $0xb0] sm:$0xff] %vm2055_vm3, %v2332_v12  ;;  %v2335_v27 = vadd.f32 %v2893_v59, %v3846_v17  ;;  %v2326_v1 = vpop.f32.mrb[55].mxu1 }
 0x2db   : > { %2390 = vst.msk [vmem:[%s3851_s7 + $0xa0] sm:$0xff] %vm2055_vm3, %v2324_v53  ;;  %v2327_v3 = vadd.f32 %v3846_v17, %v2326_v1 }
 0x2dc   : > { %2393 = vst.msk [vmem:[%s3851_s7 + $0xb8] sm:$0xff] %vm2055_vm3, %v2335_v27 }
 0x2dd   : > { %2391 = vst.msk [vmem:[%s3851_s7 + $0xa8] sm:$0xff] %vm2055_vm3, %v2327_v3 }
 0x2df   : > { %v2896_v56 = vpop.f32.mrb[56].mxu1 }
 0x2e0   : > { %v2348_v7 = vadd.f32 %v2896_v56, %v3846_v17  ;;  %v2339_v34 = vpop.f32.mrb[57].mxu1 }
 0x2e1   : > { %v2340_v44 = vadd.f32 %v3846_v17, %v2339_v34  ;;  %v2897_v35 = vpop.f32.mrb[58].mxu1 }
 0x2e2   : > { %2396 = vst.msk [vmem:[%s3851_s7 + $0xd0] sm:$0xff] %vm2055_vm3, %v2348_v7  ;;  %v2351_v63 = vadd.f32 %v2897_v35, %v3846_v17  ;;  %v2342_v15 = vpop.f32.mrb[59].mxu1 }
 0x2e3   : > { %2394 = vst.msk [vmem:[%s3851_s7 + $0xc0] sm:$0xff] %vm2055_vm3, %v2340_v44  ;;  %v2343_v21 = vadd.f32 %v3846_v17, %v2342_v15 }
 0x2e4   : > { %2397 = vst.msk [vmem:[%s3851_s7 + $0xd8] sm:$0xff] %vm2055_vm3, %v2351_v63 }
 0x2e5   : > { %2395 = vst.msk [vmem:[%s3851_s7 + $0xc8] sm:$0xff] %vm2055_vm3, %v2343_v21 }
 0x2e7   : > { %v2900_v23 = vpop.f32.mrb[60].mxu1 }
 0x2e8   : > { %v2364_v14 = vadd.f32 %v2900_v23, %v3846_v17  ;;  %v2355_v50 = vpop.f32.mrb[61].mxu1 }
 0x2e9   : > { %v2356_v8 = vadd.f32 %v3846_v17, %v2355_v50  ;;  %v2901_v18 = vpop.f32.mrb[62].mxu1 }
 0x2ea   : > { %2400 = vst.msk [vmem:[%s3851_s7 + $0xf0] sm:$0xff] %vm2055_vm3, %v2364_v14  ;;  %v2367_v13 = vadd.f32 %v2901_v18, %v3846_v17  ;;  %v2358_v58 = vpop.f32.mrb[63].mxu1 }
 0x2eb   : > { %2398 = vst.msk [vmem:[%s3851_s7 + $0xe0] sm:$0xff] %vm2055_vm3, %v2356_v8  ;;  %v2359_v0 = vadd.f32 %v3846_v17, %v2358_v58 }
 0x2ec   : > { %2401 = vst.msk [vmem:[%s3851_s7 + $0xf8] sm:$0xff] %vm2055_vm3, %v2367_v13 }
 0x2ed   : > { %2399 = vst.msk [vmem:[%s3851_s7 + $0xe8] sm:$0xff] %vm2055_vm3, %v2359_v0 }
 0x2ee PF: > { %p12_p9 = scmp.ge.s32.totalorder %s3226_s22, 4   ;;  %s3971_s18 = smov %s3171_s19 }
 0x2ef   : > { %s3972_s19 = smov %s3235_s25  ;;  %s3973_s20 = smov %s3226_s22 }
 0x2f0   :  { %14 = sbr.rel (!%p12_p9) target bundleno = 2 (0x2), region = 120 }

</bundles_post_ra>
